<compile_context>
chip_gen: v6e
topology: v6e:2x2x1
jax: 0.10.0
libtpu: 0.0.40
codegen_flags: <defaults>
</compile_context>

<pallas_src>
import functools
import math

import jax
import jax.numpy as jnp
from jax.experimental import pallas as pl
from jax.experimental.pallas import tpu as pltpu


def _round_up(x, m):
    return ((x + m - 1) // m) * m


def block_kernel(x_ref,
                 g1_ref, be1_ref, g2_ref, be2_ref,
                 wqkv_ref, bqkv_ref, wp_ref, bp_ref,
                 w1_ref, bm1_ref, w2_ref, bm2_ref,
                 o_ref,
                 *, num_heads, head_dim, seq_len, true_c, batch_block):
    f32 = jnp.float32
    eps = 1e-5
    H, DK, T = num_heads, head_dim, seq_len
    HD = H * DK
    cdt = wqkv_ref.dtype                      # matmul operand dtype (bf16 or f32)
    lowp = jnp.dtype(cdt) != jnp.dtype(jnp.float32)

    x = x_ref[...].astype(f32)                # (M, Cp), rows = (batch, t), Cp lane-dense
    M, Cp = x.shape
    inv_c = 1.0 / true_c                      # LayerNorm uses the *true* C

    if Cp != true_c:
        lane = jax.lax.broadcasted_iota(jnp.int32, (1, Cp), 1)
        lane_mask = lane < true_c
    else:
        lane_mask = None

    def layer_norm(z, gamma, beta):           # f32, padded lanes stay exactly 0
        mu = jnp.sum(z, axis=-1, keepdims=True) * inv_c
        zc = z - mu
        if lane_mask is not None:
            zc = jnp.where(lane_mask, zc, 0.0)
        var = jnp.sum(zc * zc, axis=-1, keepdims=True) * inv_c
        return zc * jax.lax.rsqrt(var + eps) * gamma + beta

    # ---------------- LayerNorm 1 ----------------
    h1 = layer_norm(x, g1_ref[...], be1_ref[...])            # (M, Cp)

    # ---------------- Fused QKV projection (feature-major) ----------------
    # One wide MXU matmul; output rows are [q heads | k heads | v heads],
    # DK rows per head, so the head split below is sublane-tile aligned.
    h1_t = h1.T.astype(cdt)                                   # (Cp, M) 2-D minor transpose
    qkv_t = jnp.dot(wqkv_ref[...], h1_t,
                    preferred_element_type=f32) + bqkv_ref[...]   # (3*HD, M)

    # Head split: 3H tile-aligned sublane slices + ONE minor-dim transpose
    # (replaces the old 3H sub-128-lane slices interleaved with per-head dots).
    gh = jnp.stack([qkv_t[g * DK:(g + 1) * DK, :] for g in range(3 * H)],
                   axis=0)                                    # (3H, DK, M)
    gh = jnp.transpose(gh, (0, 2, 1))                         # (3H, M, DK)
    q, k, v = gh[:H], gh[H:2 * H], gh[2 * H:]                 # each (H, M, DK)

    # Additive causal mask over the flattened (batch, t) row index.
    rows = jax.lax.broadcasted_iota(jnp.int32, (M, M), 0)
    cols = jax.lax.broadcasted_iota(jnp.int32, (M, M), 1)
    if batch_block == 1:
        allowed = rows >= cols
    else:
        # block-diagonal causal mask across the batch tile (wastes score FLOPs;
        # batch_block=1 is the default and avoids it entirely)
        allowed = ((rows // T) == (cols // T)) & ((rows % T) >= (cols % T))
    mask_bias = jnp.where(allowed, 0.0, -1e30).astype(f32)

    # ---------------- Head-batched causal attention ----------------
    inv_sqrt_dk = 1.0 / math.sqrt(DK)
    s = jnp.einsum('hmd,hnd->hmn', q.astype(cdt), k.astype(cdt),
                   preferred_element_type=f32)                # (H, M, M)
    s = s * inv_sqrt_dk + mask_bias
    s = s - jnp.max(s, axis=-1, keepdims=True)
    p = jnp.exp(s)
    denom = jnp.sum(p, axis=-1, keepdims=True)
    if lowp:
        p = p * pl.reciprocal(denom, approx=True)             # EUP slot, frees VPU
    else:
        p = p / denom                                         # exact path for f32 check
    a = jnp.einsum('hmn,hnd->hmd', p.astype(cdt), v.astype(cdt),
                   preferred_element_type=f32)                # (H, M, DK)
    a = jnp.maximum(a, 0.0)                # relu(concat) == per-head relu (elementwise)

    # ---------------- Fused output projection ----------------
    concat = jnp.concatenate([a[h] for h in range(H)], axis=-1)   # (M, HD), head-major
    mha = jnp.dot(concat.astype(cdt), wp_ref[...],
                  preferred_element_type=f32) + bp_ref[...]       # (M, Cp)

    x1 = x + mha                                              # residual 1 (f32)

    # ---------------- LayerNorm 2 + MLP ----------------
    h2 = layer_norm(x1, g2_ref[...], be2_ref[...])
    hid = jnp.maximum(
        jnp.dot(h2.astype(cdt), w1_ref[...],
                preferred_element_type=f32) + bm1_ref[...], 0.0)  # (M, HIDp)
    mlp = jnp.dot(hid.astype(cdt), w2_ref[...],
                  preferred_element_type=f32) + bm2_ref[...]      # (M, Cp)

    o_ref[...] = (x1 + mlp).astype(o_ref.dtype)               # residual 2, lane-dense store


def block_forward(x, params, *, batch_block=1, compute_dtype=jnp.bfloat16,
                  out_dtype=None, vmem_limit_bytes=48 * 1024 * 1024):
    """params is the ordered list of raw (per-head) parameter arrays."""
    (g1, be1, g2, be2, wq, bq, wk, bk, wv, bv, wp, bp, w1, bm1, w2, bm2) = params
    B, T, C = x.shape
    H, _, DK = wq.shape
    HD = H * DK
    HID = w1.shape[-1]
    O = w2.shape[-1]
    assert O == C, "residual connection requires output_size == input_size"
    assert B % batch_block == 0, "batch must be divisible by batch_block"
    M_blk = batch_block * T
    assert (M_blk % 8 == 0) or (batch_block == B), \
        "batch_block * context_size must be a multiple of 8 (sublane tile)"

    f32 = jnp.float32
    Cp = _round_up(C, 128)          # lane-dense embedding / output
    HIDp = _round_up(HID, 128)      # lane-dense MLP hidden
    out_dtype = x.dtype if out_dtype is None else out_dtype

    def pad2(a, rows, cols):
        pr, pc = rows - a.shape[0], cols - a.shape[1]
        if pr == 0 and pc == 0:
            return a
        return jnp.pad(a, ((0, pr), (0, pc)))

    # Feature-major fused QKV weight: (3*HD, Cp), rows = [q heads | k heads | v heads],
    # DK rows (output features) per head.
    def head_major_t(w):            # (H, C, DK) -> (H*DK, C)
        return jnp.transpose(w, (0, 2, 1)).reshape(HD, C)

    wqkv_t = jnp.concatenate(
        [head_major_t(wq), head_major_t(wk), head_major_t(wv)], axis=0)
    wqkv_t = pad2(wqkv_t.astype(f32), 3 * HD, Cp).astype(compute_dtype)
    bqkv = jnp.concatenate(
        [bq.reshape(HD), bk.reshape(HD), bv.reshape(HD)]).astype(f32).reshape(3 * HD, 1)

    wp2 = pad2(wp.reshape(HD, C).astype(f32), HD, Cp).astype(compute_dtype)
    bp_r = pad2(bp.reshape(1, C).astype(f32), 1, Cp)

    # LayerNorm params zero-padded so padded lanes stay exactly zero.
    g1p = pad2(g1.reshape(1, C).astype(f32), 1, Cp)
    be1p = pad2(be1.reshape(1, C).astype(f32), 1, Cp)
    g2p = pad2(g2.reshape(1, C).astype(f32), 1, Cp)
    be2p = pad2(be2.reshape(1, C).astype(f32), 1, Cp)

    w1p = pad2(w1.astype(f32), Cp, HIDp).astype(compute_dtype)
    bm1p = pad2(bm1.reshape(1, HID).astype(f32), 1, HIDp)
    w2p = pad2(w2.astype(f32), HIDp, Cp).astype(compute_dtype)
    bm2p = pad2(bm2.reshape(1, O).astype(f32), 1, Cp)

    x2 = pad2(x.reshape(B * T, C).astype(f32), B * T, Cp)     # (B*T, Cp)

    fused = [g1p, be1p, g2p, be2p, wqkv_t, bqkv, wp2, bp_r, w1p, bm1p, w2p, bm2p]

    def const_spec(p):              # grid-invariant (weight) blocks
        n = p.ndim
        return pl.BlockSpec(p.shape, lambda b, _n=n: (0,) * _n)

    in_specs = [pl.BlockSpec((M_blk, Cp), lambda b: (b, 0))]
    in_specs += [const_spec(p) for p in fused]

    kernel = functools.partial(block_kernel, num_heads=H, head_dim=DK,
                               seq_len=T, true_c=C, batch_block=batch_block)

    # Advisory cost estimate so XLA schedules surrounding HLO around the call.
    flops = (2 * B * T * Cp * 3 * HD          # fused QKV projection
             + 2 * B * H * T * T * DK * 2     # qk^T and att @ v
             + 2 * B * T * HD * Cp            # output projection
             + 2 * B * T * Cp * HIDp          # MLP layer 1
             + 2 * B * T * HIDp * Cp)         # MLP layer 2
    transcendentals = B * H * T * T           # softmax exp
    bytes_accessed = (int(x2.size) * x2.dtype.itemsize
                      + B * T * Cp * jnp.dtype(out_dtype).itemsize
                      + sum(int(p.size) * p.dtype.itemsize for p in fused))

    out2 = pl.pallas_call(
        kernel,
        out_shape=jax.ShapeDtypeStruct((B * T, Cp), out_dtype),
        grid_spec=pltpu.PrefetchScalarGridSpec(
            num_scalar_prefetch=0,
            grid=(B // batch_block,),
            in_specs=in_specs,
            out_specs=pl.BlockSpec((M_blk, Cp), lambda b: (b, 0)),
        ),
        compiler_params=pltpu.CompilerParams(
            dimension_semantics=("parallel",),
            vmem_limit_bytes=vmem_limit_bytes,
        ),
        cost_estimate=pl.CostEstimate(flops=flops,
                                      transcendentals=transcendentals,
                                      bytes_accessed=bytes_accessed),
    )(x2, *fused)

    return out2[:, :O].reshape(B, T, O)


def ref_forward(x, params):
    """Pure-JAX f32 reference with identical math (sanity check)."""
    (g1, be1, g2, be2, wq, bq, wk, bk, wv, bv, wp, bp, w1, bm1, w2, bm2) = params
    eps = 1e-5

    def ln(z, g, b):
        mu = jnp.mean(z, axis=-1, keepdims=True)
        var = jnp.mean((z - mu) ** 2, axis=-1, keepdims=True)
        return (z - mu) * jax.lax.rsqrt(var + eps) * g + b

    B, T, C = x.shape
    h1 = ln(x, g1, be1)
    q = jnp.einsum('btc,hcd->bhtd', h1, wq) + bq[None]
    k = jnp.einsum('btc,hcd->bhtd', h1, wk) + bk[None]
    v = jnp.einsum('btc,hcd->bhtd', h1, wv) + bv[None]
    s = jnp.einsum('bhtd,bhsd->bhts', q, k) / jnp.sqrt(jnp.float32(q.shape[-1]))
    causal = jnp.tril(jnp.ones((T, T), bool))
    s = jnp.where(causal[None, None], s, -jnp.inf)
    p = jax.nn.softmax(s, axis=-1)
    a = jnp.maximum(jnp.einsum('bhts,bhsd->bhtd', p, v), 0.0)
    mha = jnp.einsum('bhtd,hdc->btc', a, wp) + bp
    x1 = x + mha
    h2 = ln(x1, g2, be2)
    mlp = jnp.maximum(h2 @ w1 + bm1, 0.0) @ w2 + bm2
    return x1 + mlp


if __name__ == "__main__":
    # Small shapes consistent with the module.
    B, T = 2, 8                    # batch, context_size
    C = 32                         # input_size
    DK = 16                        # atten_kqv_size (query/key/value emb size)
    H = 4                          # num_head
    HID = 64                       # mlp_hidden_size
    O = C                          # output_size (== input_size so residual is valid)

    key = jax.random.PRNGKey(0)
    keys = jax.random.split(key, 12)
    f32 = jnp.float32

    # LayerNorm params (PyTorch init: gamma=1, beta=0)
    g1, be1 = jnp.ones((1, C), f32), jnp.zeros((1, C), f32)
    g2, be2 = jnp.ones((1, C), f32), jnp.zeros((1, C), f32)

    sc = 0.1
    wq = sc * jax.random.normal(keys[0], (H, C, DK), f32)
    bq = sc * jax.random.normal(keys[1], (H, 1, DK), f32)
    wk = sc * jax.random.normal(keys[2], (H, C, DK), f32)
    bk = sc * jax.random.normal(keys[3], (H, 1, DK), f32)
    wv = sc * jax.random.normal(keys[4], (H, C, DK), f32)
    bv = sc * jax.random.normal(keys[5], (H, 1, DK), f32)
    wp = sc * jax.random.normal(keys[6], (H, DK, C), f32)   # proj weight, head-major
    bp = sc * jax.random.normal(keys[7], (1, C), f32)
    w1 = sc * jax.random.normal(keys[8], (C, HID), f32)
    bm1 = sc * jax.random.normal(keys[9], (1, HID), f32)
    w2 = sc * jax.random.normal(keys[10], (HID, O), f32)
    bm2 = sc * jax.random.normal(keys[11], (1, O), f32)

    params = [g1, be1, g2, be2, wq, bq, wk, bk, wv, bv, wp, bp, w1, bm1, w2, bm2]

    x = jax.random.normal(jax.random.PRNGKey(42), (B, T, C), f32)

    ref = ref_forward(x, params)

    # Tight check with f32 matmul operands (validates fused/padded weight math).
    out_f32 = jax.block_until_ready(
        block_forward(x, params, compute_dtype=jnp.float32))
    assert out_f32.shape == (B, T, O)
    assert jnp.allclose(out_f32, ref, rtol=1e-4, atol=1e-4), "f32 mismatch vs reference"

    # Default perf path: bf16 matmul operands, f32 accumulation (looser tol).
    out = jax.block_until_ready(block_forward(x, params))
    assert out.shape == (B, T, O)
    assert jnp.allclose(out, ref, rtol=3e-2, atol=3e-2), "bf16 mismatch vs reference"

    print("KERNEL_OK")
</pallas_src>

<mosaic_0001>
module attributes {stable_mosaic.version = 11 : i64} {
  func.func @block_kernel(%arg0: i32, %arg1: memref<8x128xf32, #tpu.memory_space<vmem>>, %arg2: memref<1x128xf32, #tpu.memory_space<vmem>>, %arg3: memref<1x128xf32, #tpu.memory_space<vmem>>, %arg4: memref<1x128xf32, #tpu.memory_space<vmem>>, %arg5: memref<1x128xf32, #tpu.memory_space<vmem>>, %arg6: memref<192x128xf32, #tpu.memory_space<vmem>>, %arg7: memref<192x1xf32, #tpu.memory_space<vmem>>, %arg8: memref<64x128xf32, #tpu.memory_space<vmem>>, %arg9: memref<1x128xf32, #tpu.memory_space<vmem>>, %arg10: memref<128x128xf32, #tpu.memory_space<vmem>>, %arg11: memref<1x128xf32, #tpu.memory_space<vmem>>, %arg12: memref<128x128xf32, #tpu.memory_space<vmem>>, %arg13: memref<1x128xf32, #tpu.memory_space<vmem>>, %arg14: memref<8x128xf32, #tpu.memory_space<vmem>>) attributes {dimension_semantics = [#tpu.dimension_semantics<parallel>], iteration_bounds = array<i64: 2>, scalar_prefetch = 0 : i64, scratch_operands = 0 : i64, tpu.core_type = #tpu.core_type<tc>, window_params = [{transform_indices = @transform_0, window_bounds = array<i64: 8, 128>}, {pipeline_mode = #tpu.pipeline_mode<synchronous>, transform_indices = @transform_1, window_bounds = array<i64: 1, 128>}, {pipeline_mode = #tpu.pipeline_mode<synchronous>, transform_indices = @transform_2, window_bounds = array<i64: 1, 128>}, {pipeline_mode = #tpu.pipeline_mode<synchronous>, transform_indices = @transform_3, window_bounds = array<i64: 1, 128>}, {pipeline_mode = #tpu.pipeline_mode<synchronous>, transform_indices = @transform_4, window_bounds = array<i64: 1, 128>}, {pipeline_mode = #tpu.pipeline_mode<synchronous>, transform_indices = @transform_5, window_bounds = array<i64: 192, 128>}, {pipeline_mode = #tpu.pipeline_mode<synchronous>, transform_indices = @transform_6, window_bounds = array<i64: 192, 1>}, {pipeline_mode = #tpu.pipeline_mode<synchronous>, transform_indices = @transform_7, window_bounds = array<i64: 64, 128>}, {pipeline_mode = #tpu.pipeline_mode<synchronous>, transform_indices = @transform_8, window_bounds = array<i64: 1, 128>}, {pipeline_mode = #tpu.pipeline_mode<synchronous>, transform_indices = @transform_9, window_bounds = array<i64: 128, 128>}, {pipeline_mode = #tpu.pipeline_mode<synchronous>, transform_indices = @transform_10, window_bounds = array<i64: 1, 128>}, {pipeline_mode = #tpu.pipeline_mode<synchronous>, transform_indices = @transform_11, window_bounds = array<i64: 128, 128>}, {pipeline_mode = #tpu.pipeline_mode<synchronous>, transform_indices = @transform_12, window_bounds = array<i64: 1, 128>}, {transform_indices = @transform_13, window_bounds = array<i64: 8, 128>}]} {
    %c0 = arith.constant 0 : index
    %c0_0 = arith.constant 0 : index
    %0 = vector.load %arg1[%c0, %c0_0] : memref<8x128xf32, #tpu.memory_space<vmem>>, vector<8x128xf32>
    %1 = tpu.iota {dimensions = array<i32: 1>} : vector<1x128xi32>
    %c32_i32 = arith.constant 32 : i32
    %2 = vector.broadcast %c32_i32 : i32 to vector<1x128xi32>
    %3 = arith.cmpi slt, %1, %2 : vector<1x128xi32>
    %c0_1 = arith.constant 0 : index
    %c0_2 = arith.constant 0 : index
    %4 = vector.load %arg2[%c0_1, %c0_2] : memref<1x128xf32, #tpu.memory_space<vmem>>, vector<1x128xf32>
    %c0_3 = arith.constant 0 : index
    %c0_4 = arith.constant 0 : index
    %5 = vector.load %arg3[%c0_3, %c0_4] : memref<1x128xf32, #tpu.memory_space<vmem>>, vector<1x128xf32>
    %cst = arith.constant dense<0.000000e+00> : vector<8xf32>
    %6 = vector.multi_reduction <add>, %0, %cst [1] : vector<8x128xf32> to vector<8xf32>
    %7 = vector.shape_cast %6 : vector<8xf32> to vector<8x1xf32>
    %cst_5 = arith.constant 3.125000e-02 : f32
    %8 = vector.broadcast %cst_5 : f32 to vector<8x1xf32>
    %9 = arith.mulf %7, %8 : vector<8x1xf32>
    %10 = vector.broadcast %9 : vector<8x1xf32> to vector<8x128xf32>
    %11 = arith.subf %0, %10 : vector<8x128xf32>
    %cst_6 = arith.constant 0.000000e+00 : f32
    %12 = vector.shape_cast %3 : vector<1x128xi1> to vector<1x128xi1>
    %13 = vector.broadcast %12 : vector<1x128xi1> to vector<8x128xi1>
    %14 = vector.broadcast %cst_6 : f32 to vector<8x128xf32>
    %15 = arith.select %13, %11, %14 : vector<8x128xi1>, vector<8x128xf32>
    %16 = arith.mulf %15, %15 : vector<8x128xf32>
    %cst_7 = arith.constant dense<0.000000e+00> : vector<8xf32>
    %17 = vector.multi_reduction <add>, %16, %cst_7 [1] : vector<8x128xf32> to vector<8xf32>
    %18 = vector.shape_cast %17 : vector<8xf32> to vector<8x1xf32>
    %cst_8 = arith.constant 3.125000e-02 : f32
    %19 = vector.broadcast %cst_8 : f32 to vector<8x1xf32>
    %20 = arith.mulf %18, %19 : vector<8x1xf32>
    %cst_9 = arith.constant 9.99999974E-6 : f32
    %21 = vector.broadcast %cst_9 : f32 to vector<8x1xf32>
    %22 = arith.addf %20, %21 : vector<8x1xf32>
    %23 = math.rsqrt %22 : vector<8x1xf32>
    %24 = vector.broadcast %23 : vector<8x1xf32> to vector<8x128xf32>
    %25 = arith.mulf %15, %24 : vector<8x128xf32>
    %26 = vector.broadcast %4 : vector<1x128xf32> to vector<8x128xf32>
    %27 = arith.mulf %25, %26 : vector<8x128xf32>
    %28 = vector.broadcast %5 : vector<1x128xf32> to vector<8x128xf32>
    %29 = arith.addf %27, %28 : vector<8x128xf32>
    %30 = tpu.transpose %29, [1, 0] : vector<8x128xf32> -> vector<128x8xf32>
    %c0_10 = arith.constant 0 : index
    %c0_11 = arith.constant 0 : index
    %31 = vector.load %arg6[%c0_10, %c0_11] : memref<192x128xf32, #tpu.memory_space<vmem>>, vector<192x128xf32>
    %cst_12 = arith.constant dense<0.000000e+00> : vector<192x8xf32>
    %32 = tpu.matmul %31, %30, %cst_12 {dimension_numbers = #tpu.dot_dimension_numbers<[1], [0], [0], [1], [0, 0, 1, 1], [], []>} : vector<192x128xf32>, vector<128x8xf32>, vector<192x8xf32> -> vector<192x8xf32>
    %c0_13 = arith.constant 0 : index
    %c0_14 = arith.constant 0 : index
    %33 = vector.load %arg7[%c0_13, %c0_14] : memref<192x1xf32, #tpu.memory_space<vmem>>, vector<192x1xf32>
    %34 = vector.broadcast %33 : vector<192x1xf32> to vector<192x8xf32>
    %35 = arith.addf %32, %34 : vector<192x8xf32>
    %36 = vector.extract_strided_slice %35 {offsets = [0, 0], sizes = [16, 8], strides = [1, 1]} : vector<192x8xf32> to vector<16x8xf32>
    %37 = vector.extract_strided_slice %35 {offsets = [16, 0], sizes = [16, 8], strides = [1, 1]} : vector<192x8xf32> to vector<16x8xf32>
    %38 = vector.extract_strided_slice %35 {offsets = [32, 0], sizes = [16, 8], strides = [1, 1]} : vector<192x8xf32> to vector<16x8xf32>
    %39 = vector.extract_strided_slice %35 {offsets = [48, 0], sizes = [16, 8], strides = [1, 1]} : vector<192x8xf32> to vector<16x8xf32>
    %40 = vector.extract_strided_slice %35 {offsets = [64, 0], sizes = [16, 8], strides = [1, 1]} : vector<192x8xf32> to vector<16x8xf32>
    %41 = vector.extract_strided_slice %35 {offsets = [80, 0], sizes = [16, 8], strides = [1, 1]} : vector<192x8xf32> to vector<16x8xf32>
    %42 = vector.extract_strided_slice %35 {offsets = [96, 0], sizes = [16, 8], strides = [1, 1]} : vector<192x8xf32> to vector<16x8xf32>
    %43 = vector.extract_strided_slice %35 {offsets = [112, 0], sizes = [16, 8], strides = [1, 1]} : vector<192x8xf32> to vector<16x8xf32>
    %44 = vector.extract_strided_slice %35 {offsets = [128, 0], sizes = [16, 8], strides = [1, 1]} : vector<192x8xf32> to vector<16x8xf32>
    %45 = vector.extract_strided_slice %35 {offsets = [144, 0], sizes = [16, 8], strides = [1, 1]} : vector<192x8xf32> to vector<16x8xf32>
    %46 = vector.extract_strided_slice %35 {offsets = [160, 0], sizes = [16, 8], strides = [1, 1]} : vector<192x8xf32> to vector<16x8xf32>
    %47 = vector.extract_strided_slice %35 {offsets = [176, 0], sizes = [16, 8], strides = [1, 1]} : vector<192x8xf32> to vector<16x8xf32>
    %48 = vector.shape_cast %36 : vector<16x8xf32> to vector<1x16x8xf32>
    %49 = vector.shape_cast %37 : vector<16x8xf32> to vector<1x16x8xf32>
    %50 = vector.shape_cast %38 : vector<16x8xf32> to vector<1x16x8xf32>
    %51 = vector.shape_cast %39 : vector<16x8xf32> to vector<1x16x8xf32>
    %52 = vector.shape_cast %40 : vector<16x8xf32> to vector<1x16x8xf32>
    %53 = vector.shape_cast %41 : vector<16x8xf32> to vector<1x16x8xf32>
    %54 = vector.shape_cast %42 : vector<16x8xf32> to vector<1x16x8xf32>
    %55 = vector.shape_cast %43 : vector<16x8xf32> to vector<1x16x8xf32>
    %56 = vector.shape_cast %44 : vector<16x8xf32> to vector<1x16x8xf32>
    %57 = vector.shape_cast %45 : vector<16x8xf32> to vector<1x16x8xf32>
    %58 = vector.shape_cast %46 : vector<16x8xf32> to vector<1x16x8xf32>
    %59 = vector.shape_cast %47 : vector<16x8xf32> to vector<1x16x8xf32>
    %60 = tpu.concatenate %48, %49, %50, %51, %52, %53, %54, %55, %56, %57, %58, %59 in 0 : vector<1x16x8xf32>, vector<1x16x8xf32>, vector<1x16x8xf32>, vector<1x16x8xf32>, vector<1x16x8xf32>, vector<1x16x8xf32>, vector<1x16x8xf32>, vector<1x16x8xf32>, vector<1x16x8xf32>, vector<1x16x8xf32>, vector<1x16x8xf32>, vector<1x16x8xf32> -> vector<12x16x8xf32>
    %61 = tpu.transpose %60, [0, 2, 1] : vector<12x16x8xf32> -> vector<12x8x16xf32>
    %62 = vector.extract_strided_slice %61 {offsets = [0, 0, 0], sizes = [4, 8, 16], strides = [1, 1, 1]} : vector<12x8x16xf32> to vector<4x8x16xf32>
    %63 = vector.extract_strided_slice %61 {offsets = [4, 0, 0], sizes = [4, 8, 16], strides = [1, 1, 1]} : vector<12x8x16xf32> to vector<4x8x16xf32>
    %64 = vector.extract_strided_slice %61 {offsets = [8, 0, 0], sizes = [4, 8, 16], strides = [1, 1, 1]} : vector<12x8x16xf32> to vector<4x8x16xf32>
    %65 = tpu.iota {dimensions = array<i32: 0>} : vector<8x8xi32>
    %66 = tpu.iota {dimensions = array<i32: 1>} : vector<8x8xi32>
    %67 = arith.cmpi sge, %65, %66 : vector<8x8xi32>
    %cst_15 = arith.constant 0.000000e+00 : f32
    %cst_16 = arith.constant -1.000000e+30 : f32
    %68 = vector.broadcast %cst_15 : f32 to vector<8x8xf32>
    %69 = vector.broadcast %cst_16 : f32 to vector<8x8xf32>
    %70 = arith.select %67, %68, %69 : vector<8x8xi1>, vector<8x8xf32>
    "tpu.trace_start"() <{level = 10 : i32, message = "hmd,hnd->hmn"}> : () -> ()
    %cst_17 = arith.constant dense<0.000000e+00> : vector<4x8x8xf32>
    %71 = tpu.matmul %62, %63, %cst_17 {dimension_numbers = #tpu.dot_dimension_numbers<[2], [2], [1], [1], [0, 0, 0, 1, 1, 1], [0], [0]>} : vector<4x8x16xf32>, vector<4x8x16xf32>, vector<4x8x8xf32> -> vector<4x8x8xf32>
    "tpu.trace_stop"() : () -> ()
    %cst_18 = arith.constant 2.500000e-01 : f32
    %72 = vector.broadcast %cst_18 : f32 to vector<4x8x8xf32>
    %73 = arith.mulf %71, %72 : vector<4x8x8xf32>
    %74 = vector.shape_cast %70 : vector<8x8xf32> to vector<1x8x8xf32>
    %75 = vector.broadcast %74 : vector<1x8x8xf32> to vector<4x8x8xf32>
    %76 = arith.addf %73, %75 : vector<4x8x8xf32>
    %cst_19 = arith.constant dense<0xFF800000> : vector<4x8xf32>
    %77 = vector.multi_reduction <maximumf>, %76, %cst_19 [2] : vector<4x8x8xf32> to vector<4x8xf32>
    %78 = vector.shape_cast %77 : vector<4x8xf32> to vector<4x8x1xf32>
    %79 = vector.broadcast %78 : vector<4x8x1xf32> to vector<4x8x8xf32>
    %80 = arith.subf %76, %79 : vector<4x8x8xf32>
    %81 = math.exp %80 : vector<4x8x8xf32>
    %cst_20 = arith.constant dense<0.000000e+00> : vector<4x8xf32>
    %82 = vector.multi_reduction <add>, %81, %cst_20 [2] : vector<4x8x8xf32> to vector<4x8xf32>
    %83 = vector.shape_cast %82 : vector<4x8xf32> to vector<4x8x1xf32>
    %84 = vector.broadcast %83 : vector<4x8x1xf32> to vector<4x8x8xf32>
    %85 = arith.divf %81, %84 : vector<4x8x8xf32>
    "tpu.trace_start"() <{level = 10 : i32, message = "hmn,hnd->hmd"}> : () -> ()
    %cst_21 = arith.constant dense<0.000000e+00> : vector<4x8x16xf32>
    %86 = tpu.matmul %85, %64, %cst_21 {dimension_numbers = #tpu.dot_dimension_numbers<[2], [1], [1], [2], [0, 0, 0, 1, 1, 2], [0], [0]>} : vector<4x8x8xf32>, vector<4x8x16xf32>, vector<4x8x16xf32> -> vector<4x8x16xf32>
    "tpu.trace_stop"() : () -> ()
    %cst_22 = arith.constant 0.000000e+00 : f32
    %87 = vector.broadcast %cst_22 : f32 to vector<4x8x16xf32>
    %88 = arith.maximumf %86, %87 : vector<4x8x16xf32>
    %89 = vector.extract_strided_slice %88 {offsets = [0, 0, 0], sizes = [1, 8, 16], strides = [1, 1, 1]} : vector<4x8x16xf32> to vector<1x8x16xf32>
    %90 = vector.shape_cast %89 : vector<1x8x16xf32> to vector<8x16xf32>
    %91 = vector.extract_strided_slice %88 {offsets = [1, 0, 0], sizes = [1, 8, 16], strides = [1, 1, 1]} : vector<4x8x16xf32> to vector<1x8x16xf32>
    %92 = vector.shape_cast %91 : vector<1x8x16xf32> to vector<8x16xf32>
    %93 = vector.extract_strided_slice %88 {offsets = [2, 0, 0], sizes = [1, 8, 16], strides = [1, 1, 1]} : vector<4x8x16xf32> to vector<1x8x16xf32>
    %94 = vector.shape_cast %93 : vector<1x8x16xf32> to vector<8x16xf32>
    %95 = vector.extract_strided_slice %88 {offsets = [3, 0, 0], sizes = [1, 8, 16], strides = [1, 1, 1]} : vector<4x8x16xf32> to vector<1x8x16xf32>
    %96 = vector.shape_cast %95 : vector<1x8x16xf32> to vector<8x16xf32>
    %97 = tpu.concatenate %90, %92, %94, %96 in 1 : vector<8x16xf32>, vector<8x16xf32>, vector<8x16xf32>, vector<8x16xf32> -> vector<8x64xf32>
    %c0_23 = arith.constant 0 : index
    %c0_24 = arith.constant 0 : index
    %98 = vector.load %arg8[%c0_23, %c0_24] : memref<64x128xf32, #tpu.memory_space<vmem>>, vector<64x128xf32>
    %cst_25 = arith.constant dense<0.000000e+00> : vector<8x128xf32>
    %99 = tpu.matmul %97, %98, %cst_25 {dimension_numbers = #tpu.dot_dimension_numbers<[1], [0], [0], [1], [0, 0, 1, 1], [], []>} : vector<8x64xf32>, vector<64x128xf32>, vector<8x128xf32> -> vector<8x128xf32>
    %c0_26 = arith.constant 0 : index
    %c0_27 = arith.constant 0 : index
    %100 = vector.load %arg9[%c0_26, %c0_27] : memref<1x128xf32, #tpu.memory_space<vmem>>, vector<1x128xf32>
    %101 = vector.broadcast %100 : vector<1x128xf32> to vector<8x128xf32>
    %102 = arith.addf %99, %101 : vector<8x128xf32>
    %103 = arith.addf %0, %102 : vector<8x128xf32>
    %c0_28 = arith.constant 0 : index
    %c0_29 = arith.constant 0 : index
    %104 = vector.load %arg4[%c0_28, %c0_29] : memref<1x128xf32, #tpu.memory_space<vmem>>, vector<1x128xf32>
    %c0_30 = arith.constant 0 : index
    %c0_31 = arith.constant 0 : index
    %105 = vector.load %arg5[%c0_30, %c0_31] : memref<1x128xf32, #tpu.memory_space<vmem>>, vector<1x128xf32>
    %cst_32 = arith.constant dense<0.000000e+00> : vector<8xf32>
    %106 = vector.multi_reduction <add>, %103, %cst_32 [1] : vector<8x128xf32> to vector<8xf32>
    %107 = vector.shape_cast %106 : vector<8xf32> to vector<8x1xf32>
    %cst_33 = arith.constant 3.125000e-02 : f32
    %108 = vector.broadcast %cst_33 : f32 to vector<8x1xf32>
    %109 = arith.mulf %107, %108 : vector<8x1xf32>
    %110 = vector.broadcast %109 : vector<8x1xf32> to vector<8x128xf32>
    %111 = arith.subf %103, %110 : vector<8x128xf32>
    %cst_34 = arith.constant 0.000000e+00 : f32
    %112 = vector.shape_cast %3 : vector<1x128xi1> to vector<1x128xi1>
    %113 = vector.broadcast %112 : vector<1x128xi1> to vector<8x128xi1>
    %114 = vector.broadcast %cst_34 : f32 to vector<8x128xf32>
    %115 = arith.select %113, %111, %114 : vector<8x128xi1>, vector<8x128xf32>
    %116 = arith.mulf %115, %115 : vector<8x128xf32>
    %cst_35 = arith.constant dense<0.000000e+00> : vector<8xf32>
    %117 = vector.multi_reduction <add>, %116, %cst_35 [1] : vector<8x128xf32> to vector<8xf32>
    %118 = vector.shape_cast %117 : vector<8xf32> to vector<8x1xf32>
    %cst_36 = arith.constant 3.125000e-02 : f32
    %119 = vector.broadcast %cst_36 : f32 to vector<8x1xf32>
    %120 = arith.mulf %118, %119 : vector<8x1xf32>
    %cst_37 = arith.constant 9.99999974E-6 : f32
    %121 = vector.broadcast %cst_37 : f32 to vector<8x1xf32>
    %122 = arith.addf %120, %121 : vector<8x1xf32>
    %123 = math.rsqrt %122 : vector<8x1xf32>
    %124 = vector.broadcast %123 : vector<8x1xf32> to vector<8x128xf32>
    %125 = arith.mulf %115, %124 : vector<8x128xf32>
    %126 = vector.broadcast %104 : vector<1x128xf32> to vector<8x128xf32>
    %127 = arith.mulf %125, %126 : vector<8x128xf32>
    %128 = vector.broadcast %105 : vector<1x128xf32> to vector<8x128xf32>
    %129 = arith.addf %127, %128 : vector<8x128xf32>
    %c0_38 = arith.constant 0 : index
    %c0_39 = arith.constant 0 : index
    %130 = vector.load %arg10[%c0_38, %c0_39] : memref<128x128xf32, #tpu.memory_space<vmem>>, vector<128x128xf32>
    %cst_40 = arith.constant dense<0.000000e+00> : vector<8x128xf32>
    %131 = tpu.matmul %129, %130, %cst_40 {dimension_numbers = #tpu.dot_dimension_numbers<[1], [0], [0], [1], [0, 0, 1, 1], [], []>} : vector<8x128xf32>, vector<128x128xf32>, vector<8x128xf32> -> vector<8x128xf32>
    %c0_41 = arith.constant 0 : index
    %c0_42 = arith.constant 0 : index
    %132 = vector.load %arg11[%c0_41, %c0_42] : memref<1x128xf32, #tpu.memory_space<vmem>>, vector<1x128xf32>
    %133 = vector.broadcast %132 : vector<1x128xf32> to vector<8x128xf32>
    %134 = arith.addf %131, %133 : vector<8x128xf32>
    %cst_43 = arith.constant 0.000000e+00 : f32
    %135 = vector.broadcast %cst_43 : f32 to vector<8x128xf32>
    %136 = arith.maximumf %134, %135 : vector<8x128xf32>
    %c0_44 = arith.constant 0 : index
    %c0_45 = arith.constant 0 : index
    %137 = vector.load %arg12[%c0_44, %c0_45] : memref<128x128xf32, #tpu.memory_space<vmem>>, vector<128x128xf32>
    %cst_46 = arith.constant dense<0.000000e+00> : vector<8x128xf32>
    %138 = tpu.matmul %136, %137, %cst_46 {dimension_numbers = #tpu.dot_dimension_numbers<[1], [0], [0], [1], [0, 0, 1, 1], [], []>} : vector<8x128xf32>, vector<128x128xf32>, vector<8x128xf32> -> vector<8x128xf32>
    %c0_47 = arith.constant 0 : index
    %c0_48 = arith.constant 0 : index
    %139 = vector.load %arg13[%c0_47, %c0_48] : memref<1x128xf32, #tpu.memory_space<vmem>>, vector<1x128xf32>
    %140 = vector.broadcast %139 : vector<1x128xf32> to vector<8x128xf32>
    %141 = arith.addf %138, %140 : vector<8x128xf32>
    %142 = arith.addf %103, %141 : vector<8x128xf32>
    %c0_49 = arith.constant 0 : index
    %c0_50 = arith.constant 0 : index
    %143 = vector.load %arg14[%c0_49, %c0_50] : memref<8x128xf32, #tpu.memory_space<vmem>>, vector<8x128xf32>
    tpu.vector_store %arg14[%c0_49, %c0_50], %142 {strides = array<i32>} : memref<8x128xf32, #tpu.memory_space<vmem>>, vector<8x128xf32>,
    return
  }
  func.func @transform_0(%arg0: i32) -> (i32, i32) {
    %c0_i32 = arith.constant 0 : i32
    %c0_i32_0 = arith.constant 0 : i32
    return %arg0, %c0_i32 : i32, i32
  }
  func.func @transform_1(%arg0: i32) -> (i32, i32) {
    %c0_i32 = arith.constant 0 : i32
    %c0_i32_0 = arith.constant 0 : i32
    %c0_i32_1 = arith.constant 0 : i32
    return %c0_i32, %c0_i32_0 : i32, i32
  }
  func.func @transform_2(%arg0: i32) -> (i32, i32) {
    %c0_i32 = arith.constant 0 : i32
    %c0_i32_0 = arith.constant 0 : i32
    %c0_i32_1 = arith.constant 0 : i32
    return %c0_i32, %c0_i32_0 : i32, i32
  }
  func.func @transform_3(%arg0: i32) -> (i32, i32) {
    %c0_i32 = arith.constant 0 : i32
    %c0_i32_0 = arith.constant 0 : i32
    %c0_i32_1 = arith.constant 0 : i32
    return %c0_i32, %c0_i32_0 : i32, i32
  }
  func.func @transform_4(%arg0: i32) -> (i32, i32) {
    %c0_i32 = arith.constant 0 : i32
    %c0_i32_0 = arith.constant 0 : i32
    %c0_i32_1 = arith.constant 0 : i32
    return %c0_i32, %c0_i32_0 : i32, i32
  }
  func.func @transform_5(%arg0: i32) -> (i32, i32) {
    %c0_i32 = arith.constant 0 : i32
    %c0_i32_0 = arith.constant 0 : i32
    %c0_i32_1 = arith.constant 0 : i32
    return %c0_i32, %c0_i32_0 : i32, i32
  }
  func.func @transform_6(%arg0: i32) -> (i32, i32) {
    %c0_i32 = arith.constant 0 : i32
    %c0_i32_0 = arith.constant 0 : i32
    %c0_i32_1 = arith.constant 0 : i32
    return %c0_i32, %c0_i32_0 : i32, i32
  }
  func.func @transform_7(%arg0: i32) -> (i32, i32) {
    %c0_i32 = arith.constant 0 : i32
    %c0_i32_0 = arith.constant 0 : i32
    %c0_i32_1 = arith.constant 0 : i32
    return %c0_i32, %c0_i32_0 : i32, i32
  }
  func.func @transform_8(%arg0: i32) -> (i32, i32) {
    %c0_i32 = arith.constant 0 : i32
    %c0_i32_0 = arith.constant 0 : i32
    %c0_i32_1 = arith.constant 0 : i32
    return %c0_i32, %c0_i32_0 : i32, i32
  }
  func.func @transform_9(%arg0: i32) -> (i32, i32) {
    %c0_i32 = arith.constant 0 : i32
    %c0_i32_0 = arith.constant 0 : i32
    %c0_i32_1 = arith.constant 0 : i32
    return %c0_i32, %c0_i32_0 : i32, i32
  }
  func.func @transform_10(%arg0: i32) -> (i32, i32) {
    %c0_i32 = arith.constant 0 : i32
    %c0_i32_0 = arith.constant 0 : i32
    %c0_i32_1 = arith.constant 0 : i32
    return %c0_i32, %c0_i32_0 : i32, i32
  }
  func.func @transform_11(%arg0: i32) -> (i32, i32) {
    %c0_i32 = arith.constant 0 : i32
    %c0_i32_0 = arith.constant 0 : i32
    %c0_i32_1 = arith.constant 0 : i32
    return %c0_i32, %c0_i32_0 : i32, i32
  }
  func.func @transform_12(%arg0: i32) -> (i32, i32) {
    %c0_i32 = arith.constant 0 : i32
    %c0_i32_0 = arith.constant 0 : i32
    %c0_i32_1 = arith.constant 0 : i32
    return %c0_i32, %c0_i32_0 : i32, i32
  }
  func.func @transform_13(%arg0: i32) -> (i32, i32) {
    %c0_i32 = arith.constant 0 : i32
    %c0_i32_0 = arith.constant 0 : i32
    return %arg0, %c0_i32 : i32, i32
  }
}

</mosaic_0001>

<bundles_post_ra>
// kernel: tpu_custom_call.1
= control target key start
LH: loop header
LB: loop body
LE: loop exit
PB: predicated region body
PF: predicated region fallthrough
CT: control target
= control target key end

     0   :  { %s3501_s0 = inlined_call_operand.hbm [shape: f32[16,128], index: 0, kind: input, shape index: {}]   ;;  %s3502_s1 = inlined_call_operand.vmem [shape: f32[1,128], index: 1, kind: input, shape index: {}]   ;;  %s3503_s2 = inlined_call_operand.vmem [shape: f32[1,128], index: 2, kind: input, shape index: {}]   ;;  %s3504_s3 = inlined_call_operand.vmem [shape: f32[1,128], index: 3, kind: input, shape index: {}]   ;;  %s3505_s4 = inlined_call_operand.vmem [shape: f32[1,128], index: 4, kind: input, shape index: {}]   ;;  %s3506_s5 = inlined_call_operand.vmem [shape: f32[192,128], index: 5, kind: input, shape index: {}]   ;;  %s3507_s6 = inlined_call_operand.vmem [shape: f32[192,1], index: 6, kind: input, shape index: {}]   ;;  %s3508_s7 = inlined_call_operand.hbm [shape: f32[64,128], index: 7, kind: input, shape index: {}]   ;;  %s3509_s8 = inlined_call_operand.vmem [shape: f32[1,128], index: 8, kind: input, shape index: {}]   ;;  %s3510_s9 = inlined_call_operand.hbm [shape: f32[128,128], index: 9, kind: input, shape index: {}]   ;;  %s3511_s10 = inlined_call_operand.vmem [shape: f32[1,128], index: 10, kind: input, shape index: {}]   ;;  %s3512_s11 = inlined_call_operand.hbm [shape: f32[128,128], index: 11, kind: input, shape index: {}]   ;;  %s3513_s12 = inlined_call_operand.vmem [shape: f32[1,128], index: 12, kind: input, shape index: {}]   ;;  %s3514_s13 = inlined_call_operand.hbm [shape: f32[16,128], index: 13, kind: output, shape index: {}]  }
   0x1   :  { %3524 = sst [smem:[#allocation20_spill]] %s3508_s7 }
   0x2   :  { %3525 = sst [smem:[#allocation21_spill]] %s3510_s9 }
   0x3   :  { %3526 = sst [smem:[#allocation22_spill]] %s3512_s11 }
   0x4   :  { %18 = vsyncpa [#allocation3], 0 }
   0x5   :  { %20 = vsyncpa [#allocation3 + $0x1], 0 }
   0x6   :  { %21 = vsyncpa [#allocation6], 0 }
   0x7   :  { %22 = vsyncpa [#allocation9], 0 }
   0x8   :  { %23 = vsyncpa [#allocation4], 0 }
   0x9   :  { %25 = vsyncpa [#allocation4 + $0x1], 0  ;;  %s3027_s25 = smov 0   ;;  %s3029_s26 = smov 0  }
   0xa   :  { %s3031_s27 = smov 0   ;;  %s3033_s28 = smov 0  }
   0xb LB: > { %3527 = sst [smem:[#allocation15_spill]] %s2929_s25  ;;  %s3048_s29 = sadd.s32 4294967295, %s2941_s28   ;;  %s2941_s28 = sphi %s3033_s28, %s3553_s28   ;;  %s2937_s27 = sphi %s3031_s27, %s3555_s27   ;;  %s2933_s26 = sphi %s3029_s26, %s3557_s26   ;;  %s2929_s25 = sphi %s3027_s25, %s3556_s25  }
   0xc   : > { %3528 = sst [smem:[#allocation16_spill]] %s2937_s27  ;;  %s2366_s30 = sadd.s32 4294967294, %s2941_s28  }
   0xd   : > { %p51_p0 = scmp.ne.s32.totalorder %s2933_s26, %s2929_s25  ;;  %p3516_p1 = scmp.eq.s32.totalorder %s3048_s29, 0 }
   0xe   : > { %p333_p3 = scmp.eq.s32.totalorder %s2366_s30, 1  ;;  %p2367_p5 = scmp.ge.s32.totalorder %s2941_s28, 1 }
   0xf   : > { %p3057_p4 = por %p3516_p1, %p51_p0  ;;  %p340_p7 = scmp.lt.s32.totalorder %s2941_s28, 3 }
  0x10   : > { %p3062_p6 = por %p333_p3, %p51_p0  ;;  %s2943_s17 = smov [#allocation5]  }
  0x11   : > { %s3529_s14 = scalar_select %p3057_p4, 1, 0 }
  0x12   : > { %s3530_s15 = scalar_select %p3062_p6, 1, 0 }
  0x13   : > { %p3067_p8 = pnand %p2367_p5, %p340_p7  ;;  %s370_s18 = sshll.u32 %s2943_s17, 4  ;;  %s371_s18 = int_to_ptr.vmem [resolvable:$true] %s370_s18 }
  0x14   : > { %3531 = sst [smem:[#allocation17_spill]] %s3530_s15  ;;  %s2944_s20 = smov [#allocation7]  }
  0x15   : > { %s3532_s16 = scalar_select %p3067_p8, 1, 0 }
  0x16   : > { %p2671_p9 = pneg %p3067_p8  ;;  %s386_s21 = sshll.u32 %s2944_s20, 4  ;;  %s387_s21 = int_to_ptr.vmem [resolvable:$true] %s386_s21 }
  0x17   : > { %s2945_s22 = smov [#allocation8]   ;;  %s2774_s24 = scalar_lea.vmem %s371_s18, 1024 }
  0x18   : > { %p3076_p11 = pnand %p2671_p9, %p3516_p1  ;;  %s402_s23 = sshll.u32 %s2945_s22, 4  ;;  %s403_s23 = int_to_ptr.vmem [resolvable:$true] %s402_s23 }
  0x19   : > { %p2775_p13 = scmp.ne.s32.totalorder %s371_s18, %s2774_s24  ;;  %p2782_p5 = scmp.lt.s32.totalorder %s371_s18, %s371_s18 }
  0x1a   : > { %p2765_p12 = pneg %p3076_p11  ;;  %p2783_p7 = scmp.lt.s32.totalorder %s2774_s24, %s2774_s24 }
  0x1c   : > { %p2777_p0 = pnand %p2775_p13, %p2765_p12  ;;  %p2784_p9 = por %p2783_p7, %p2782_p5 }
  0x1e   : > { %p2778_p3 = pneg %p2777_p0 }
  0x20   : > { %p2785_p10 = pnand %p2784_p9, %p2778_p3 }
  0x22   : > { %2788 = shalt.err (!%p2785_p10)
}
  0x23   : > { %s2946_s30 = smov 128   ;;  %s2947_s17 = smov 8  }
  0x24   : > { %s3534_s7 = sld [smem:[#allocation20_spill]]  ;;  %s2800_s15 = scalar_lea.vmem %s387_s21, 2048 }
  0x25   : > { %p2801_p1 = scmp.ne.s32.totalorder %s387_s21, %s2800_s15  ;;  %p2808_p2 = scmp.lt.s32.totalorder %s387_s21, %s387_s21 }
  0x26   : > { %p2809_p6 = scmp.lt.s32.totalorder %s2800_s15, %s2800_s15 }
  0x27   : > { %p2803_p13 = pnand %p2801_p1, %p2765_p12 }
  0x28   : > { %p2810_p5 = por %p2809_p6, %p2808_p2 }
  0x29   : > { %p2804_p0 = pneg %p2803_p13 }
  0x2a   : > { %2674 = dma.hbm_to_vmem [thread:$0]  (!%p3076_p11), %s3534_s7, 1024, %s371_s18, [#allocation6], %s2946_s30, %s2946_s30, %s2947_s17  }
  0x2b   : > { %p2811_p3 = pnand %p2810_p5, %p2804_p0 }
  0x2d   : > { %2814 = shalt.err (!%p2811_p3)
}
  0x2e   : > { %s3535_s9 = sld [smem:[#allocation21_spill]]  ;;  %s2826_s18 = scalar_lea.vmem %s403_s23, 2048 }
  0x2f   : > { %p2827_p10 = scmp.ne.s32.totalorder %s403_s23, %s2826_s18  ;;  %p2834_p9 = scmp.lt.s32.totalorder %s403_s23, %s403_s23 }
  0x30   : > { %p2835_p13 = scmp.lt.s32.totalorder %s2826_s18, %s2826_s18 }
  0x31   : > { %p2829_p7 = pnand %p2827_p10, %p2765_p12 }
  0x32   : > { %p2836_p4 = por %p2835_p13, %p2834_p9 }
  0x33   : > { %p2830_p1 = pneg %p2829_p7 }
  0x34   : > { %2677 = dma.hbm_to_vmem [thread:$0]  (!%p3076_p11), %s3535_s9, 2048, %s387_s21, [#allocation6], %s2946_s30, %s2946_s30, %s2947_s17  }
  0x35   : > { %p2837_p2 = pnand %p2836_p4, %p2830_p1 }
  0x37   : > { %2840 = shalt.err (!%p2837_p2)
}
  0x38   : > { %s3536_s11 = sld [smem:[#allocation22_spill]]  ;;  %s3107_s25 = sadd.s32 1, %s2941_s28  }
  0x39   : > { %3537 = sst [smem:[#allocation18_spill]] %s3107_s25  ;;  %s35_s21 = ssub.s32 %s2941_s28, %s3107_s25 }
  0x3a   : > { %s38_s19 = sadd.s32 1, %s2937_s27  ;;  %p36_p4 = scmp.eq.s32.totalorder %s35_s21, 0 }
  0x3b   : > { %p45_p6 = scmp.ne.s32.totalorder %s2937_s27, %s2933_s26  ;;  %p46_p12 = scmp.eq.s32.totalorder %s2941_s28, 0 }
  0x3c   : > { %p2692_p0 = scmp.lt.s32.totalorder %s2941_s28, 2  ;;  %p3539_p3 = scmp.eq.s32.totalorder %s3048_s29, 1 }
  0x3d   : > { %s3117_s22 = scalar_select %p36_p4, %s2937_s27, %s38_s19  }
  0x3e   : > { %2680 = dma.hbm_to_vmem [thread:$0]  (!%p3076_p11), %s3536_s11, 2048, %s403_s23, [#allocation9], %s2946_s30, %s2946_s30, %s2947_s17  }
  0x3f   : > { %3538 = sst [smem:[#allocation19_spill]] %s3117_s22  ;;  %p47_p5 = por %p46_p12, %p45_p6 }
  0x40   : > { %p3121_p10 = por %p3539_p3, %p45_p6  ;;  %s419_s18 = sand.u32 1, %s2937_s27  }
  0x41   : > { %s2373_s15 = sshll.u32 %s2941_s28, 7  ;;  %s2372_s23 = sshll.u32 %s419_s18, 3 }
  0x42   : > { %s3540_s24 = scalar_select %p3121_p10, 1, 0 }
  0x43   : > { %s3130_s20 = scalar_lea.hbm %s3501_s0, %s2373_s15  ;;  %s423_s21 = scalar_lea.vmem [#allocation2], %s2372_s23 }
  0x44   : > { %s430_s19 = sshll.u32 %s423_s21, 4  ;;  %p3132_p11 = pnand %p2692_p0, %p47_p5  ;;  %s431_s19 = int_to_ptr.vmem [resolvable:$true] %s430_s19 }
  0x45   : > { %s420_s9 = scalar_lea.sflag [#allocation3], %s419_s18  ;;  %s2841_s11 = scalar_lea.hbm %s3130_s20, 128 }
  0x46   : > { %p2842_p7 = scmp.ne.s32.totalorder %s3130_s20, %s2841_s11  ;;  %p2843_p1 = pneg %p3132_p11 }
  0x47   : > { %s2846_s17 = scalar_lea.hbm %s3501_s0, 256  ;;  %p2847_p2 = scmp.lt.s32.totalorder %s3130_s20, %s3501_s0 }
  0x48   : > { %p2844_p9 = pnand %p2843_p1, %p2842_p7  ;;  %p2848_p4 = scmp.lt.s32.totalorder %s2846_s17, %s2841_s11 }
  0x4a   : > { %p2845_p13 = pneg %p2844_p9  ;;  %p2849_p6 = por %p2848_p4, %p2847_p2 }
  0x4c   : > { %p2850_p12 = pnand %p2849_p6, %p2845_p13 }
  0x4e   : > { %2853 = shalt.err (!%p2850_p12)
}
  0x4f   : > { %s2854_s21 = scalar_lea.vmem %s431_s19, 128  ;;  %s2948_s18 = smov [#allocation2]  }
  0x50   : > { %p2855_p0 = scmp.ne.s32.totalorder %s431_s19, %s2854_s21  ;;  %s2859_s27 = sshll.u32 %s2948_s18, 4  ;;  %s2860_s27 = int_to_ptr.vmem [resolvable:$false] %s2859_s27 }
  0x51   : > { %s2861_s25 = scalar_lea.vmem %s2860_s27, 256  ;;  %p2862_p7 = scmp.lt.s32.totalorder %s431_s19, %s2860_s27 }
  0x52   : > { %p2857_p5 = pnand %p2855_p0, %p2843_p1  ;;  %p2863_p9 = scmp.lt.s32.totalorder %s2861_s25, %s2854_s21 }
  0x54   : > { %p2858_p3 = pneg %p2857_p5  ;;  %p2864_p10 = por %p2863_p9, %p2862_p7 }
  0x56   : > { %p2865_p8 = pnand %p2864_p10, %p2858_p3 }
  0x58   : > { %2868 = shalt.err (!%p2865_p8)
}
  0x59   : > { %2684 = dma.hbm_to_vmem [thread:$0]  (!%p3132_p11), %s3130_s20, 128, %s431_s19, %s420_s9  }
  0x5a   : > { %p3542_p13 = scmp.ne.s32.totalorder %s3532_s16, 0 }
  0x5b   : > { %s3153_s11 = sand.u32 (!%p3542_p13), 1, %s2933_s26   ;;  %p3543_p10 = scmp.ne.s32.totalorder (!%p3542_p13), %s3529_s14, 0 }
  0x5c   : > { %439 = sbr.rel (%p3542_p13) target bundleno = 2607 (0xa2f), region = 72  ;;  %s2375_s22 = sshll.u32 (!%p3542_p13), %s3153_s11, 3 }
  0x5d   : > { %s442_s27 = scalar_lea.sflag (!%p3542_p13), [#allocation3], %s3153_s11  ;;  %s445_s25 = scalar_lea.vmem (!%p3542_p13), [#allocation2], %s2375_s22 }
  0x61   : > { %2912 = dma.done.wait (%p3543_p10), %s442_s27, 128  }
  0x62   : > { %2914 = vsyncadd (%p3543_p10), %s442_s27, 4294967168  ;;  %p3544_p8 = scmp.eq.s32.totalorder %s3048_s29, 0 }
  0x64   : > { %2916 = dma.done.wait (%p3544_p8), [#allocation6], 3072   ;;  %p3545_p11 = pmov %p3544_p8 }
  0x65   : > { %p3546_p1 = pmov %p3544_p8 }
  0x66   : > { %2918 = vsyncadd (%p3545_p11), [#allocation6], 4294964224 }
  0x67   : > { %2920 = dma.done.wait (%p3546_p1), [#allocation9], 2048   ;;  %p3547_p2 = pmov %p3546_p1 }
  0x68   : > { %v3171_v0 = vld [vmem:[%s445_s25] sm:$0xff]  ;;  %v501_v1 = vlaneseq  ;;  %v2949_v10 = vmov 0   ;;  %v568_v12 = vld [vmem:[%s3507_s6 + $0x50] sm:$0xff]  ;;  %v569_v14 = vld [vmem:[%s3507_s6 + $0x58] sm:$0xff]  ;;  %v2950_v63 = vmov 0.0   ;;  %vm2951_vm1 = vmmov 0  }
  0x69   : > { %2922 = vsyncadd (%p3547_p2), [#allocation9], 4294965248  ;;  %506 = vadd.xlane.f32.xlu0 %v3171_v0  ;;  %v534_v8 = vld [vmem:[%s3506_s5] sm:$0xff]  ;;  %2741 = vset.pattern.permute.xlu1 %v2949_v10  ;;  %v567_v11 = vld [vmem:[%s3507_s6 + $0x48] sm:$0xff]  ;;  %vm1275_vm2 = vcmask 130048   ;;  %vm1588_vm4 = vcmask 64512  }
  0x6a   : > { %v3175_v2 = vand.u32 127, %v501_v1  ;;  %2490 = vmatprep.mubr.f32.mxu0 %v534_v8  ;;  %v566_v9 = vld [vmem:[%s3507_s6 + $0x40] sm:$0xff]  ;;  %2742 = vset.pattern.permute.xlu0 %v2949_v10  ;;  %v559_v13 = vld [vmem:[%s3507_s6 + $0x8] sm:$0xff]  ;;  %v560_v15 = vld [vmem:[%s3507_s6 + $0x10] sm:$0xff]  ;;  %s2953_s14 = smov 16   ;;  %s2954_s16 = smov 32  }
  0x6b   : > { %624 = vperm.xlu1 %2741, %v566_v9   ;;  %v570_v16 = vld [vmem:[%s3507_s6 + $0x60] sm:$0xff]  ;;  %v561_v17 = vld [vmem:[%s3507_s6 + $0x18] sm:$0xff]  ;;  %v571_v19 = vld [vmem:[%s3507_s6 + $0x68] sm:$0xff]  ;;  %2526 = vmatprep.subr.mxu1 %v2950_v63  ;;  %s2955_s20 = smov 48   ;;  %vm1942_vm5 = vcmask 261120   ;;  %vm1944_vm6 = vcmask 392192  }
  0x6c   : > { %vm503_vm0 = vcmp.lt.s32.totalorder %v3175_v2, 32  ;;  %v558_v18 = vld [vmem:[%s3507_s6] sm:$0xff]  ;;  %v564_v20 = vld [vmem:[%s3507_s6 + $0x30] sm:$0xff]  ;;  %v563_v23 = vld [vmem:[%s3507_s6 + $0x28] sm:$0xff]  ;;  %2528 = vmatprep.mubr.msk.f32.mxu1 %vm2951_vm1, %v2950_v63  ;;  %vm1961_vm7 = vcmask 523264   ;;  %s2401_s9 = sshll.u32 %s3048_s29, 7 }
  0x6d   : > { %v562_v21 = vld [vmem:[%s3507_s6 + $0x20] sm:$0xff]  ;;  %v572_v22 = vld [vmem:[%s3507_s6 + $0x70] sm:$0xff]  ;;  %v573_v24 = vld [vmem:[%s3507_s6 + $0x78] sm:$0xff]  ;;  %s2265_s15 = scalar_lea.hbm %s3514_s13, %s2401_s9  ;;  %s2254_s30 = scalar_lea.sflag [#allocation4], %s3153_s11 }
  0x6e   : > { %v565_v25 = vld [vmem:[%s3507_s6 + $0x38] sm:$0xff]  ;;  %v2380_v30 = vld [vmem:[%s3502_s1] ss:$0 sm:$0xff]  ;;  %v535_v35 = vld [vmem:[%s3506_s5 + $0x8] sm:$0xff]  ;;  %p3548_p6 = scmp.ne.s32.totalorder %s3540_s24, 0  ;;  %s2956_s29 = smov [#allocation10]  }
  0x6f   : > { %629 = vperm.xlu1 %2741, %v567_v11   ;;  %v2381_v32 = vld [vmem:[%s3503_s2] ss:$0 sm:$0xff]  ;;  %v536_v36 = vld [vmem:[%s3506_s5 + $0x10] sm:$0xff]  ;;  %v537_v37 = vld [vmem:[%s3506_s5 + $0x18] sm:$0xff]  ;;  %s2873_s23 = sshll.u32 %s2956_s29, 4  ;;  %s2874_s23 = int_to_ptr.vmem [resolvable:$false] %s2873_s23 }
  0x70   : > { %v538_v38 = vld [vmem:[%s3506_s5 + $0x20] sm:$0xff]  ;;  %v539_v39 = vld [vmem:[%s3506_s5 + $0x28] sm:$0xff]  ;;  %v540_v40 = vld [vmem:[%s3506_s5 + $0x30] sm:$0xff] }
  0x71   : > { %v541_v41 = vld [vmem:[%s3506_s5 + $0x38] sm:$0xff]  ;;  %v542_v42 = vld [vmem:[%s3506_s5 + $0x40] sm:$0xff]  ;;  %v543_v43 = vld [vmem:[%s3506_s5 + $0x48] sm:$0xff] }
  0x72   : > { %v544_v44 = vld [vmem:[%s3506_s5 + $0x50] sm:$0xff]  ;;  %v545_v45 = vld [vmem:[%s3506_s5 + $0x58] sm:$0xff]  ;;  %v546_v46 = vld [vmem:[%s3506_s5 + $0x60] sm:$0xff] }
  0x73   : > { %634 = vperm.xlu1 %2741, %v568_v12   ;;  %v547_v47 = vld [vmem:[%s3506_s5 + $0x68] sm:$0xff]  ;;  %v548_v48 = vld [vmem:[%s3506_s5 + $0x70] sm:$0xff]  ;;  %v549_v49 = vld [vmem:[%s3506_s5 + $0x78] sm:$0xff] }
  0x77   : > { %589 = vperm.xlu1 %2741, %v559_v13  }
  0x7b   : > { %639 = vperm.xlu1 %2741, %v569_v14  }
  0x7f   : > { %594 = vperm.xlu1 %2741, %v560_v15  }
  0x83   : > { %644 = vperm.xlu1 %2741, %v570_v16  }
  0x87   : > { %599 = vperm.xlu1 %2741, %v561_v17  }
  0x8b   : > { %649 = vperm.xlu1 %2741, %v571_v19  }
  0x8f   : > { %604 = vperm.xlu1 %2741, %v562_v21  }
  0x93   : > { %654 = vperm.xlu1 %2741, %v572_v22  }
  0x97   : > { %609 = vperm.xlu1 %2741, %v563_v23  }
  0x9b   : > { %659 = vperm.xlu1 %2741, %v573_v24  }
  0x9f   : > { %619 = vperm.xlu1 %2741, %v565_v25  }
  0xe6   : > { %v625_v50 = vpop.permute.xlu1 %624 }
  0xea   : > { %v630_v51 = vpop.permute.xlu1 %629 }
  0xee   : > { %v635_v52 = vpop.permute.xlu1 %634 }
  0xf2   : > { %v507_v3 = vpop.xlane.xlu0 %506  ;;  %v590_v53 = vpop.permute.xlu1 %589 }
  0xf3   : > { %v508_v4 = vmul.f32 0.03125, %v507_v3 }
  0xf5   : > { %v509_v5 = vsub.f32 %v3171_v0, %v508_v4 }
  0xf6   : > { %v640_v54 = vpop.permute.xlu1 %639 }
  0xf7   : > { %v512_v6 = vsel %vm503_vm0, %v509_v5, 0.0 }
  0xf8   : > { %v513_v7 = vmul.f32 %v512_v6, %v512_v6 }
  0xfa   : > { %514 = vadd.xlane.f32.xlu0 %v513_v7  ;;  %v595_v55 = vpop.permute.xlu1 %594 }
  0xfe   : > { %v645_v58 = vpop.permute.xlu1 %644 }
 0x102   : > { %v600_v5 = vpop.permute.xlu1 %599 }
 0x106   : > { %v650_v10 = vpop.permute.xlu1 %649 }
 0x10a   : > { %v605_v15 = vpop.permute.xlu1 %604 }
 0x110   : > { %584 = vperm.xlu0 %2742, %v558_v18  }
 0x114   : > { %614 = vperm.xlu0 %2742, %v564_v20   ;;  %v655_v20 = vpop.permute.xlu1 %654 }
 0x183   : > { %v515_v26 = vpop.xlane.xlu0 %514 }
 0x184   : > { %v516_v27 = vmul.f32 0.03125, %v515_v26 }
 0x186   : > { %v517_v28 = vadd.f32 1e-05, %v516_v27  ;;  %v610_v27 = vpop.permute.xlu1 %609 }
 0x188   : > { %2743 = vrsqrt.f32 %v517_v28 }
 0x18b   : > { %v585_v57 = vpop.permute.xlu0 %584 }
 0x195   : > { %v2744_v29 = vpop.eup %2743 }
 0x196   : > { %v519_v31 = vmul.f32 %v2744_v29, %v512_v6 }
 0x198   : > { %v526_v33 = vmul.f32 %v2380_v30, %v519_v31  ;;  %v660_v31 = vpop.permute.xlu1 %659 }
 0x19a   : > { %v533_v34 = vadd.f32 %v2381_v32, %v526_v33 }
 0x19c   : > { %2488 = vmatprep.subr.mxu0 %v533_v34 }
 0x19d   : > { %2489 = vmatpush3.xpose.msra.mxu0 %v533_v34  ;;  %v615_v34 = vpop.permute.xlu0 %614 }
 0x19e   : > { %2585 = vmatprep.subr.mxu0 %v2950_v63 }
 0x1a0   : > { %2491 = vmatmul.mubr.f32.vlgmr.msra.gmra.mxu0 %v535_v35  ;;  %v550_v35 = vld [vmem:[%s3506_s5 + $0x80] sm:$0xff] }
 0x1a1   : > { %2493 = vmatprep.mubr.f32.mxu0 %v536_v36  ;;  %v551_v36 = vld [vmem:[%s3506_s5 + $0x88] sm:$0xff] }
 0x1a4   : > { %2494 = vmatmul.mubr.f32.gmra.mxu0 %v537_v37  ;;  %v552_v37 = vld [vmem:[%s3506_s5 + $0x90] sm:$0xff] }
 0x1a5   : > { %2496 = vmatprep.mubr.f32.mxu0 %v538_v38 }
 0x1a8   : > { %2497 = vmatmul.mubr.f32.gmra.mxu0 %v539_v39  ;;  %v553_v39 = vld [vmem:[%s3506_s5 + $0x98] sm:$0xff] }
 0x1a9   : > { %2499 = vmatprep.mubr.f32.mxu0 %v540_v40  ;;  %v620_v40 = vpop.permute.xlu1 %619 }
 0x1ac   : > { %2500 = vmatmul.mubr.f32.gmra.mxu0 %v541_v41  ;;  %v554_v41 = vld [vmem:[%s3506_s5 + $0xa0] sm:$0xff] }
 0x1ad   : > { %2502 = vmatprep.mubr.f32.mxu0 %v542_v42 }
 0x1b0   : > { %2503 = vmatmul.mubr.f32.gmra.mxu0 %v543_v43  ;;  %v555_v43 = vld [vmem:[%s3506_s5 + $0xa8] sm:$0xff] }
 0x1b1   : > { %2505 = vmatprep.mubr.f32.mxu0 %v544_v44  ;;  %v556_v44 = vld [vmem:[%s3506_s5 + $0xb0] sm:$0xff] }
 0x1b4   : > { %2506 = vmatmul.mubr.f32.gmra.mxu0 %v545_v45  ;;  %v557_v45 = vld [vmem:[%s3506_s5 + $0xb8] sm:$0xff] }
 0x1b5   : > { %2508 = vmatprep.mubr.f32.mxu0 %v546_v46 }
 0x1b8   : > { %2509 = vmatmul.mubr.f32.gmra.mxu0 %v547_v47 }
 0x1b9   : > { %2511 = vmatprep.mubr.f32.mxu0 %v548_v48 }
 0x1bc   : > { %2512 = vmatmul.mubr.f32.gmra.mxu0 %v549_v49 }
 0x1bd   : > { %2514 = vmatprep.mubr.f32.mxu0 %v550_v35 }
 0x1c0   : > { %2515 = vmatmul.mubr.f32.gmra.mxu0 %v551_v36 }
 0x1c1   : > { %2517 = vmatprep.mubr.f32.mxu0 %v552_v37 }
 0x1c4   : > { %2518 = vmatmul.mubr.f32.gmra.mxu0 %v553_v39 }
 0x1c5   : > { %2520 = vmatprep.mubr.f32.mxu0 %v554_v41 }
 0x1c8   : > { %2521 = vmatmul.mubr.f32.gmra.mxu0 %v555_v43 }
 0x1c9   : > { %2523 = vmatprep.mubr.f32.mxu0 %v556_v44 }
 0x1cc   : > { %2524 = vmatmul.mubr.f32.gmra.mxu0 %v557_v45 }
 0x1cd   : > { %2617 = vmatprep.mubr.msk.f32.mxu0 %vm2951_vm1, %v2950_v63 }
 0x260   : > { %v2492_v56 = vpop.f32.mrf.mxu0 }
 0x261   : > { %v774_v3 = vadd.f32 %v2492_v56, %v590_v53  ;;  %v2952_v56 = vmov -1e+30  }
 0x262   : > { %v768_v59 = vpop.f32.mrf.mxu0 }
 0x263   : > { %v769_v60 = vadd.f32 %v768_v59, %v585_v57 }
 0x264   : > { %v2495_v61 = vpop.f32.mrf.mxu0 }
 0x265   : > { %887 = vxpose.xlu1.b32.start [1/2] (short) (narrow) %v769_v60, 8  ;;  %v784_v8 = vadd.f32 %v2495_v61, %v600_v5 }
 0x266   : > { %v778_v62 = vpop.f32.mrf.mxu0 }
 0x267   : > { %v779_v4 = vadd.f32 %v778_v62, %v595_v55 }
 0x268   : > { %v2498_v6 = vpop.f32.mrf.mxu0 }
 0x269   : > { %919 = vxpose.xlu0.b32.start [1/2] (short) (narrow) %v779_v4, 8  ;;  %888 = vxpose.xlu1.b32.end [2/2] (short) (narrow) %v774_v3, 8  ;;  %v794_v32 = vadd.f32 %v2498_v6, %v610_v27 }
 0x26a   : > { %v788_v7 = vpop.f32.mrf.mxu0 }
 0x26b   : > { %v789_v29 = vadd.f32 %v788_v7, %v605_v15 }
 0x26c   : > { %v2501_v9 = vpop.f32.mrf.mxu0 }
 0x26d   : > { %920 = vxpose.xlu0.b32.end [2/2] (short) (narrow) %v784_v8, 8  ;;  %v804_v42 = vadd.f32 %v2501_v9, %v620_v40 }
 0x26e   : > { %v798_v11 = vpop.f32.mrf.mxu0 }
 0x26f   : > { %v799_v38 = vadd.f32 %v798_v11, %v615_v34 }
 0x270   : > { %v2504_v12 = vpop.f32.mrf.mxu0 }
 0x271   : > { %v814_v18 = vadd.f32 %v2504_v12, %v630_v51 }
 0x272   : > { %v808_v13 = vpop.f32.mrf.mxu0 }
 0x273   : > { %v809_v14 = vadd.f32 %v808_v13, %v625_v50 }
 0x274   : > { %v2507_v16 = vpop.f32.mrf.mxu0 }
 0x275   : > { %1015 = vxpose.xlu0.b32.start [1/2] (short) (narrow) %v809_v14, 8  ;;  %v824_v25 = vadd.f32 %v2507_v16, %v640_v54  ;;  %v1272_v54 = vshrl.u32 %v501_v1, 7  ;;  %v575_v16 = vld [vmem:[%s3507_s6 + $0x88] sm:$0xff] }
 0x276   : > { %v818_v17 = vpop.f32.mrf.mxu0 }
 0x277   : > { %v819_v22 = vadd.f32 %v818_v17, %v635_v52  ;;  %vm1273_vm3 = vcmp.ge.s32.totalorder %v1272_v54, %v3175_v2  ;;  %v578_v17 = vld [vmem:[%s3507_s6 + $0xa0] sm:$0xff]  ;;  %v2068_v2 = vld [vmem:[#allocation7 + $0x20] sm:$0xff] }
 0x278   : > { %v2510_v19 = vpop.f32.mrf.mxu0  ;;  %v1274_v57 = vsel %vm1273_vm3, 0.0, %v2952_v56 }
 0x279   : > { %1016 = vxpose.xlu0.b32.end [2/2] (short) (narrow) %v814_v18, 8  ;;  %v834_v26 = vadd.f32 %v2510_v19, %v650_v10  ;;  %v580_v18 = vld [vmem:[%s3507_s6 + $0xb0] sm:$0xff]  ;;  %v574_v19 = vld [vmem:[%s3507_s6 + $0x80] sm:$0xff] }
 0x27a   : > { %v828_v21 = vpop.f32.mrf.mxu0 }
 0x27b   : > { %v829_v23 = vadd.f32 %v828_v21, %v645_v58  ;;  %v577_v21 = vld [vmem:[%s3507_s6 + $0x98] sm:$0xff] }
 0x27c   : > { %v2513_v24 = vpop.f32.mrf.mxu0 }
 0x27d   : > { %1047 = vxpose.xlu0.b32.start [1/2] (short) (narrow) %v819_v22, 8  ;;  %1079 = vxpose.xlu1.b32.start [1/2] (short) (narrow) %v829_v23, 8  ;;  %v844_v33 = vadd.f32 %v2513_v24, %v660_v31  ;;  %v579_v22 = vld [vmem:[%s3507_s6 + $0xa8] sm:$0xff]  ;;  %v581_v23 = vld [vmem:[%s3507_s6 + $0xb8] sm:$0xff] }
 0x27e   : > { %v838_v28 = vpop.f32.mrf.mxu0 }
 0x27f   : > { %v839_v30 = vadd.f32 %v838_v28, %v655_v20  ;;  %v576_v20 = vld [vmem:[%s3507_s6 + $0x90] sm:$0xff] }
 0x280   : > { %v2516_v36 = vpop.f32.mrf.mxu0 }
 0x281   : > { %1048 = vxpose.xlu0.b32.end [2/2] (short) (narrow) %v824_v25, 8  ;;  %1080 = vxpose.xlu1.b32.end [2/2] (short) (narrow) %v834_v26, 8 }
 0x285   : > { %951 = vxpose.xlu0.b32.start [1/2] (short) (narrow) %v789_v29, 8  ;;  %1111 = vxpose.xlu1.b32.start [1/2] (short) (narrow) %v839_v30, 8 }
 0x289   : > { %952 = vxpose.xlu0.b32.end [2/2] (short) (narrow) %v794_v32, 8  ;;  %1112 = vxpose.xlu1.b32.end [2/2] (short) (narrow) %v844_v33, 8 }
 0x28d   : > { %983 = vxpose.xlu0.b32.start [1/2] (short) (narrow) %v799_v38, 8  ;;  %v848_v38 = vpop.f32.mrf.mxu0 }
 0x28f   : > { %v2519_v39 = vpop.f32.mrf.mxu0 }
 0x291   : > { %984 = vxpose.xlu0.b32.end [2/2] (short) (narrow) %v804_v42, 8  ;;  %v858_v41 = vpop.f32.mrf.mxu0 }
 0x2e1   : > { %v903_v48 = vpop.trf.xlu1 }
 0x2e5   : > { %v935_v46 = vpop.trf.xlu0 }
 0x2f1   : > { %v1031_v47 = vpop.trf.xlu0 }
 0x2f2   : > { %2527 = vmatpush3.xpose.msk.msra.mxu1 %vm1275_vm2, %v1031_v47 }
 0x2f3   : > { %2531 = vmatprep.subr.mxu1 %v2950_v63 }
 0x2f5   : > { %2529 = vmatmul.mubr.msk.f32.vlgmr.msra.gmra.mxu1 %vm1275_vm2, %v903_v48 }
 0x2f6   : > { %2533 = vmatprep.mubr.msk.f32.mxu1 %vm2951_vm1, %v2950_v63 }
 0x2f9   : > { %v1063_v49 = vpop.trf.xlu0  ;;  %v1095_v50 = vpop.trf.xlu1 }
 0x2fa   : > { %2532 = vmatpush3.xpose.msk.msra.mxu1 %vm1275_vm2, %v1063_v49 }
 0x2fb   : > { %2536 = vmatprep.subr.mxu1 %v2950_v63 }
 0x2fd   : > { %2534 = vmatmul.mubr.msk.f32.vlgmr.msra.gmra.mxu1 %vm1275_vm2, %v935_v46  ;;  %v2522_v46 = vpop.f32.mrf.mxu0 }
 0x2fe   : > { %2537 = vmatpush3.xpose.msk.msra.mxu1 %vm1275_vm2, %v1095_v50  ;;  %2538 = vmatprep.mubr.msk.f32.mxu1 %vm2951_vm1, %v2950_v63 }
 0x2ff   : > { %2541 = vmatprep.subr.mxu1 %v2950_v63  ;;  %v868_v47 = vpop.f32.mrf.mxu0 }
 0x301   : > { %v967_v51 = vpop.trf.xlu0  ;;  %v1127_v52 = vpop.trf.xlu1 }
 0x302   : > { %2539 = vmatmul.mubr.msk.f32.vlgmr.msra.gmra.mxu1 %vm1275_vm2, %v967_v51  ;;  %v2525_v50 = vpop.f32.mrf.mxu0 }
 0x303   : > { %2542 = vmatpush3.xpose.msk.msra.mxu1 %vm1275_vm2, %v1127_v52  ;;  %2543 = vmatprep.mubr.msk.f32.mxu1 %vm2951_vm1, %v2950_v63 }
 0x304   : > { %2546 = vmatprep.subr.mxu1 %v2950_v63 }
 0x309   : > { %v999_v53 = vpop.trf.xlu0 }
 0x30a   : > { %2544 = vmatmul.mubr.msk.f32.vlgmr.msra.gmra.mxu1 %vm1275_vm2, %v999_v53  ;;  %v878_v53 = vpop.f32.mrf.mxu0 }
 0x30b   : > { %2548 = vmatprep.mubr.msk.f32.mxu1 %vm2951_vm1, %v2950_v63 }
 0x3b5   : > { %v1348_v55 = vpop.f32.mrf.mxu1 }
 0x3b6   : > { %v1580_v58 = vmul.f32 0.25, %v1348_v55 }
 0x3b7   : > { %v2530_v59 = vpop.f32.mrf.mxu1 }
 0x3b8   : > { %v1584_v60 = vadd.f32 %v1580_v58, %v1274_v57 }
 0x3ba   : > { %v1589_v61 = vsel %vm1588_vm4, %v1584_v60, -inf }
 0x3bb   : > { %1590 = vmax.xlane.f32.xlu1 %v1589_v61 }
 0x3bd   : > { %v1424_v62 = vpop.f32.mrf.mxu1 }
 0x3be   : > { %v1581_v3 = vmul.f32 0.25, %v1424_v62 }
 0x3bf   : > { %v2535_v4 = vpop.f32.mrf.mxu1 }
 0x3c0   : > { %v1585_v5 = vadd.f32 %v1581_v3, %v1274_v57 }
 0x3c2   : > { %v1500_v6 = vpop.f32.mrf.mxu1  ;;  %v1592_v7 = vsel %vm1588_vm4, %v1585_v5, -inf }
 0x3c3   : > { %v1582_v1 = vmul.f32 0.25, %v1500_v6  ;;  %1593 = vmax.xlane.f32.xlu0 %v1592_v7 }
 0x3c4   : > { %v2540_v8 = vpop.f32.mrf.mxu1 }
 0x3c5   : > { %v3337_v9 = vadd.f32 %v1582_v1, %v1274_v57 }
 0x3c7   : > { %v1595_v10 = vsel %vm1588_vm4, %v3337_v9, -inf }
 0x3c8   : > { %1596 = vmax.xlane.f32.xlu1 %v1595_v10 }
 0x3ca   : > { %v1576_v11 = vpop.f32.mrf.mxu1 }
 0x3cb   : > { %v1583_v12 = vmul.f32 0.25, %v1576_v11 }
 0x3cc   : > { %v2545_v13 = vpop.f32.mrf.mxu1 }
 0x3cd   : > { %v3341_v14 = vadd.f32 %v1583_v12, %v1274_v57 }
 0x3cf   : > { %v1598_v15 = vsel %vm1588_vm4, %v3341_v14, -inf }
 0x3d0   : > { %1599 = vmax.xlane.f32.xlu1 %v1598_v15 }
 0x3d9   : > { %669 = vperm.xlu0 %2742, %v575_v16  }
 0x3dd   : > { %684 = vperm.xlu0 %2742, %v578_v17  }
 0x3e1   : > { %694 = vperm.xlu0 %2742, %v580_v18   ;;  %664 = vperm.xlu1 %2741, %v574_v19  }
 0x3e5   : > { %674 = vperm.xlu1 %2741, %v576_v20  }
 0x3e9   : > { %679 = vperm.xlu1 %2741, %v577_v21  }
 0x3ed   : > { %689 = vperm.xlu1 %2741, %v579_v22  }
 0x3f1   : > { %699 = vperm.xlu1 %2741, %v581_v23   ;;  %v1953_v23 = vld [vmem:[#allocation5 + $0x38] sm:$0xff] }
 0x444   : > { %v1591_v24 = vpop.xlane.xlu1 %1590 }
 0x445   : > { %v1601_v25 = vsub.f32 %v1584_v60, %v1591_v24  ;;  %v1952_v24 = vld [vmem:[#allocation5 + $0x30] sm:$0xff] }
 0x447   : > { %v1605_v26 = vmul.f32 1.442695, %v1601_v25  ;;  %v1951_v25 = vld [vmem:[#allocation5 + $0x28] sm:$0xff] }
 0x449   : > { %2745 = vpow2.f32 %v1605_v26  ;;  %v1950_v26 = vld [vmem:[#allocation5 + $0x20] sm:$0xff] }
 0x44c   : > { %v1594_v27 = vpop.xlane.xlu0 %1593 }
 0x44d   : > { %v1602_v28 = vsub.f32 %v1585_v5, %v1594_v27 }
 0x44f   : > { %v1607_v29 = vmul.f32 1.442695, %v1602_v28  ;;  %v1949_v28 = vld [vmem:[#allocation5 + $0x18] sm:$0xff] }
 0x451   : > { %2747 = vpow2.f32 %v1607_v29  ;;  %v1597_v34 = vpop.xlane.xlu1 %1596 }
 0x452   : > { %v1603_v57 = vsub.f32 %v3337_v9, %v1597_v34  ;;  %v1947_v34 = vld [vmem:[#allocation5 + $0x8] sm:$0xff] }
 0x454   : > { %v670_v45 = vpop.permute.xlu0 %669  ;;  %v1609_v59 = vmul.f32 1.442695, %v1603_v57  ;;  %v2076_v57 = vld [vmem:[#allocation7 + $0x60] sm:$0xff] }
 0x455   : > { %v854_v52 = vadd.f32 %v2516_v36, %v670_v45 }
 0x456   : > { %v2746_v30 = vpop.eup %2745  ;;  %2749 = vpow2.f32 %v1609_v59  ;;  %v2073_v59 = vld [vmem:[#allocation7 + $0x48] sm:$0xff] }
 0x457   : > { %v1613_v31 = vsel %vm1588_vm4, %v2746_v30, 0.0 }
 0x458   : > { %1614 = vadd.xlane.f32.xlu0 %v1613_v31  ;;  %v685_v48 = vpop.permute.xlu0 %684 }
 0x459   : > { %v1600_v35 = vpop.xlane.xlu1 %1599  ;;  %v869_v6 = vadd.f32 %v868_v47, %v685_v48 }
 0x45a   : > { %v1604_v60 = vsub.f32 %v3341_v14, %v1600_v35  ;;  %v1946_v35 = vld [vmem:[#allocation5] sm:$0xff] }
 0x45c   : > { %v695_v54 = vpop.permute.xlu0 %694  ;;  %v1611_v61 = vmul.f32 1.442695, %v1604_v60 }
 0x45d   : > { %v665_v37 = vpop.permute.xlu1 %664  ;;  %v879_v55 = vadd.f32 %v878_v53, %v695_v54  ;;  %v2079_v54 = vld [vmem:[#allocation7 + $0x78] sm:$0xff] }
 0x45e   : > { %v3370_v32 = vpop.eup %2747  ;;  %v849_v49 = vadd.f32 %v848_v38, %v665_v37  ;;  %2751 = vpow2.f32 %v1611_v61  ;;  %2586 = vmatpush3.msra.mxu0 %v2079_v54 }
 0x45f   : > { %v1616_v33 = vsel %vm1588_vm4, %v3370_v32, 0.0  ;;  %2587 = vmatprep.subr.mxu0 %v2950_v63 }
 0x460   : > { %1617 = vadd.xlane.f32.xlu1 %v1616_v33  ;;  %v1948_v33 = vld [vmem:[#allocation5 + $0x10] sm:$0xff] }
 0x461   : > { %v675_v40 = vpop.permute.xlu1 %674 }
 0x462   : > { %v859_v42 = vadd.f32 %v858_v41, %v675_v40 }
 0x463   : > { %v2750_v62 = vpop.eup %2749 }
 0x464   : > { %v1619_v3 = vsel %vm1588_vm4, %v2750_v62, 0.0 }
 0x465   : > { %v680_v43 = vpop.permute.xlu1 %679 }
 0x466   : > { %v864_v44 = vadd.f32 %v2519_v39, %v680_v43 }
 0x469   : > { %v690_v51 = vpop.permute.xlu1 %689 }
 0x46a   : > { %v874_v7 = vadd.f32 %v2522_v46, %v690_v51 }
 0x46b   : > { %v2752_v4 = vpop.eup %2751 }
 0x46c   : > { %v1622_v5 = vsel %vm1588_vm4, %v2752_v4, 0.0 }
 0x46d   : > { %v700_v56 = vpop.permute.xlu1 %699 }
 0x46e   : > { %v884_v58 = vadd.f32 %v2525_v50, %v700_v56  ;;  %v2077_v56 = vld [vmem:[#allocation7 + $0x68] sm:$0xff] }
 0x485   : > { %1175 = vxpose.xlu0.b32.start [1/2] (short) (narrow) %v859_v42, 8 }
 0x489   : > { %1176 = vxpose.xlu0.b32.end [2/2] (short) (narrow) %v864_v44, 8 }
 0x493   : > { %1143 = vxpose.xlu1.b32.start [1/2] (short) (narrow) %v849_v49, 8  ;;  %v2394_v49 = vld [vmem:[%s3509_s8] ss:$0 sm:$0xff] }
 0x497   : > { %1144 = vxpose.xlu1.b32.end [2/2] (short) (narrow) %v854_v52, 8 }
 0x49b   : > { %1239 = vxpose.xlu1.b32.start [1/2] (short) (narrow) %v879_v55, 8  ;;  %v2078_v55 = vld [vmem:[#allocation7 + $0x70] sm:$0xff] }
 0x49c   : > { %2588 = vmatpush3.msra.mxu0 %v2078_v55 }
 0x49d   : > { %2589 = vmatprep.subr.mxu0 %v2950_v63 }
 0x49e   : > { %2590 = vmatpush3.msra.mxu0 %v2077_v56 }
 0x49f   : > { %1240 = vxpose.xlu1.b32.end [2/2] (short) (narrow) %v884_v58, 8  ;;  %2591 = vmatprep.subr.mxu0 %v2950_v63  ;;  %v2075_v58 = vld [vmem:[#allocation7 + $0x58] sm:$0xff] }
 0x4a0   : > { %2592 = vmatpush3.msra.mxu0 %v2076_v57 }
 0x4a1   : > { %2593 = vmatprep.subr.mxu0 %v2950_v63 }
 0x4a2   : > { %2594 = vmatpush3.msra.mxu0 %v2075_v58 }
 0x4a3   : > { %2595 = vmatprep.subr.mxu0 %v2950_v63 }
 0x4b6   : > { %1620 = vadd.xlane.f32.xlu0 %v1619_v3 }
 0x4ba   : > { %1623 = vadd.xlane.f32.xlu0 %v1622_v5  ;;  %v2072_v5 = vld [vmem:[#allocation7 + $0x40] sm:$0xff] }
 0x4e1   : > { %v1615_v1 = vpop.xlane.xlu0 %1614 }
 0x4e2   : > { %2753 = vrcp.f32 %v1615_v1  ;;  %v2069_v1 = vld [vmem:[#allocation7 + $0x28] sm:$0xff] }
 0x4e7   : > { %1207 = vxpose.xlu0.b32.start [1/2] (short) (narrow) %v869_v6, 8  ;;  %v2071_v6 = vld [vmem:[#allocation7 + $0x38] sm:$0xff] }
 0x4e9   : > { %v1618_v8 = vpop.xlane.xlu1 %1617 }
 0x4ea   : > { %2755 = vrcp.f32 %v1618_v8  ;;  %v2067_v8 = vld [vmem:[#allocation7 + $0x18] sm:$0xff] }
 0x4eb   : > { %1208 = vxpose.xlu0.b32.end [2/2] (short) (narrow) %v874_v7, 8  ;;  %v2070_v7 = vld [vmem:[#allocation7 + $0x30] sm:$0xff] }
 0x4ef   : > { %v2754_v9 = vpop.eup %2753 }
 0x4f0   : > { %v1626_v11 = vmul.f32 %v2754_v9, %v2746_v30  ;;  %v2066_v9 = vld [vmem:[#allocation7 + $0x10] sm:$0xff] }
 0x4f7   : > { %v2756_v13 = vpop.eup %2755 }
 0x4f8   : > { %v1628_v14 = vmul.f32 %v2756_v13, %v3370_v32  ;;  %v2172_v13 = vld [vmem:[#allocation8 + $0x70] sm:$0xff] }
 0x501   : > { %v1191_v12 = vpop.trf.xlu0 }
 0x50f   : > { %v1159_v10 = vpop.trf.xlu1 }
 0x510   : > { %2547 = vmatpush3.msra.mxu1 %v1159_v10  ;;  %v2065_v10 = vld [vmem:[#allocation7 + $0x8] sm:$0xff] }
 0x511   : > { %2549 = vmatmul.mubr.msk.f32.vlgmr.msra.gmra.mxu1 %vm1588_vm4, %v1626_v11  ;;  %2551 = vmatprep.subr.mxu1 %v2950_v63  ;;  %v2064_v11 = vld [vmem:[#allocation7] sm:$0xff] }
 0x512   : > { %2552 = vmatpush3.msra.mxu1 %v1191_v12  ;;  %2553 = vmatprep.mubr.msk.f32.mxu1 %vm2951_vm1, %v2950_v63  ;;  %v2173_v12 = vld [vmem:[#allocation8 + $0x78] sm:$0xff] }
 0x513   : > { %2556 = vmatprep.subr.mxu1 %v2950_v63 }
 0x515   : > { %2554 = vmatmul.mubr.msk.f32.vlgmr.msra.gmra.mxu1 %vm1588_vm4, %v1628_v14  ;;  %v2171_v14 = vld [vmem:[#allocation8 + $0x68] sm:$0xff] }
 0x516   : > { %2558 = vmatprep.mubr.msk.f32.mxu1 %vm2951_vm1, %v2950_v63 }
 0x517   : > { %v1255_v20 = vpop.trf.xlu1 }
 0x53f   : > { %v1621_v15 = vpop.xlane.xlu0 %1620 }
 0x540   : > { %2757 = vrcp.f32 %v1621_v15  ;;  %v2170_v15 = vld [vmem:[#allocation8 + $0x60] sm:$0xff] }
 0x543   : > { %v1624_v16 = vpop.xlane.xlu0 %1623 }
 0x544   : > { %2759 = vrcp.f32 %v1624_v16  ;;  %v2169_v16 = vld [vmem:[#allocation8 + $0x58] sm:$0xff] }
 0x54d   : > { %v2758_v17 = vpop.eup %2757 }
 0x54e   : > { %v1630_v19 = vmul.f32 %v2758_v17, %v2750_v62  ;;  %v2168_v17 = vld [vmem:[#allocation8 + $0x50] sm:$0xff] }
 0x551   : > { %v2760_v21 = vpop.eup %2759 }
 0x552   : > { %v1632_v22 = vmul.f32 %v2760_v21, %v2752_v4  ;;  %v2164_v21 = vld [vmem:[#allocation8 + $0x30] sm:$0xff] }
 0x563   : > { %v1223_v18 = vpop.trf.xlu0 }
 0x564   : > { %2557 = vmatpush3.msra.mxu1 %v1223_v18  ;;  %v2167_v18 = vld [vmem:[#allocation8 + $0x48] sm:$0xff] }
 0x565   : > { %2559 = vmatmul.mubr.msk.f32.vlgmr.msra.gmra.mxu1 %vm1588_vm4, %v1630_v19  ;;  %2561 = vmatprep.subr.mxu1 %v2950_v63  ;;  %v2166_v19 = vld [vmem:[#allocation8 + $0x40] sm:$0xff] }
 0x566   : > { %2562 = vmatpush3.msra.mxu1 %v1255_v20  ;;  %2563 = vmatprep.mubr.msk.f32.mxu1 %vm2951_vm1, %v2950_v63  ;;  %v2165_v20 = vld [vmem:[#allocation8 + $0x38] sm:$0xff] }
 0x567   : > { %2566 = vmatprep.subr.mxu1 %v2950_v63 }
 0x569   : > { %2564 = vmatmul.mubr.msk.f32.vlgmr.msra.gmra.mxu1 %vm1588_vm4, %v1632_v22  ;;  %v2163_v22 = vld [vmem:[#allocation8 + $0x28] sm:$0xff] }
 0x56a   : > { %2582 = vmatprep.mubr.msk.f32.mxu1 %vm2951_vm1, %v2950_v63  ;;  %2567 = vmatpush3.msra.mxu1 %v1953_v23  ;;  %v2162_v23 = vld [vmem:[#allocation8 + $0x20] sm:$0xff] }
 0x56b   : > { %2568 = vmatprep.subr.mxu1 %v2950_v63 }
 0x56c   : > { %2569 = vmatpush3.msra.mxu1 %v1952_v24  ;;  %v2161_v24 = vld [vmem:[#allocation8 + $0x18] sm:$0xff] }
 0x56d   : > { %2570 = vmatprep.subr.mxu1 %v2950_v63 }
 0x56e   : > { %2571 = vmatpush3.msra.mxu1 %v1951_v25 }
 0x56f   : > { %2572 = vmatprep.subr.mxu1 %v2950_v63 }
 0x570   : > { %2573 = vmatpush3.msra.mxu1 %v1950_v26 }
 0x571   : > { %2574 = vmatprep.subr.mxu1 %v2950_v63 }
 0x572   : > { %2575 = vmatpush3.msra.mxu1 %v1949_v28 }
 0x573   : > { %2576 = vmatprep.subr.mxu1 %v2950_v63 }
 0x574   : > { %2577 = vmatpush3.msra.mxu1 %v1948_v33 }
 0x575   : > { %2578 = vmatprep.subr.mxu1 %v2950_v63 }
 0x576   : > { %2579 = vmatpush3.msra.mxu1 %v1947_v34  ;;  %v2160_v34 = vld [vmem:[#allocation8 + $0x10] sm:$0xff] }
 0x577   : > { %2580 = vmatprep.subr.mxu1 %v2950_v63 }
 0x578   : > { %2581 = vmatpush3.msra.mxu1 %v1946_v35  ;;  %v2159_v35 = vld [vmem:[#allocation8 + $0x8] sm:$0xff] }
 0x579   : > { %2620 = vmatprep.subr.mxu1 %v2950_v63 }
 0x5d1   : > { %v1702_v27 = vpop.f32.mrf.mxu1 }
 0x5d2   : > { %v1925_v44 = vmax.f32 %v1702_v27, 0.0 }
 0x5d3   : > { %v2550_v29 = vpop.f32.mrf.mxu1 }
 0x5d4   : > { %v2396_v29 = vld [vmem:[%s3504_s3] ss:$0 sm:$0xff] }
 0x5d5   : > { %v1775_v30 = vpop.f32.mrf.mxu1 }
 0x5d6   : > { %v1926_v31 = vmax.f32 %v1775_v30, 0.0 }
 0x5d7   : > { %v2555_v32 = vpop.f32.mrf.mxu1 }
 0x5d8   : > { %1930 = vrot.lane.b32.xlu0 %v1926_v31, %s2953_s14  ;;  %v2397_v31 = vld [vmem:[%s3505_s4] ss:$0 sm:$0xff]  ;;  %s499_s14 = scalar_lea.vmem [#allocation10], %s2375_s22  ;;  %s2875_s22 = scalar_lea.vmem %s2874_s23, 256 }
 0x625   : > { %v1848_v36 = vpop.f32.mrf.mxu1 }
 0x626   : > { %v1927_v37 = vmax.f32 %v1848_v36, 0.0  ;;  %v2158_v36 = vld [vmem:[#allocation8] sm:$0xff] }
 0x627   : > { %v2560_v38 = vpop.f32.mrf.mxu1 }
 0x628   : > { %1934 = vrot.lane.b32.xlu1 %v1927_v37, %s2954_s16  ;;  %v2398_v37 = vld [vmem:[%s3511_s10] ss:$0 sm:$0xff]  ;;  %s2267_s16 = sshll.u32 %s499_s14, 4  ;;  %s2268_s16 = int_to_ptr.vmem [resolvable:$true] %s2267_s16 }
 0x629   : > { %v1921_v39 = vpop.f32.mrf.mxu1  ;;  %s2869_s17 = scalar_lea.vmem %s2268_s16, 128  ;;  %p2876_p5 = scmp.lt.s32.totalorder %s2268_s16, %s2874_s23 }
 0x62a   : > { %v1928_v40 = vmax.f32 %v1921_v39, 0.0  ;;  %p2870_p4 = scmp.ne.s32.totalorder %s2268_s16, %s2869_s17  ;;  %p2877_p3 = scmp.lt.s32.totalorder %s2875_s22, %s2869_s17 }
 0x62b   : > { %v2565_v41 = vpop.f32.mrf.mxu1 }
 0x62c   : > { %1938 = vrot.lane.b32.xlu1 %v1928_v40, %s2955_s20  ;;  %p2871_p12 = pnand %p2870_p4, %p3548_p6  ;;  %p2878_p7 = por %p2877_p3, %p2876_p5 }
 0x62e   : > { %p2872_p0 = pneg %p2871_p12 }
 0x630   : > { %p2879_p9 = pnand %p2878_p7, %p2872_p0 }
 0x64a   : > { %v1931_v42 = vpop.permute.xlu0 %1930 }
 0x64b   : > { %v1941_v45 = vsel %vm1275_vm2, %v1925_v44, %v1931_v42  ;;  %v2399_v42 = vld [vmem:[%s3513_s12] ss:$0 sm:$0xff] }
 0x69a   : > { %v1935_v43 = vpop.permute.xlu1 %1934 }
 0x69b   : > { %v1943_v46 = vsel %vm1942_vm5, %v1941_v45, %v1935_v43 }
 0x69e   : > { %v1939_v47 = vpop.permute.xlu1 %1938 }
 0x69f   : > { %v1945_v48 = vsel %vm1944_vm6, %v1943_v46, %v1939_v47 }
 0x6a0   : > { %2583 = vmatmul.mubr.msk.f32.vlgmr.msra.gmra.mxu1 %vm1961_vm7, %v1945_v48 }
 0x6a1   : > { %2652 = vmatprep.mubr.msk.f32.mxu1 %vm2951_vm1, %v2950_v63  ;;  %2621 = vmatpush3.msra.mxu1 %v2173_v12 }
 0x6a2   : > { %2622 = vmatprep.subr.mxu1 %v2950_v63 }
 0x6a3   : > { %2623 = vmatpush3.msra.mxu1 %v2172_v13 }
 0x6a4   : > { %2624 = vmatprep.subr.mxu1 %v2950_v63 }
 0x6a5   : > { %2625 = vmatpush3.msra.mxu1 %v2171_v14 }
 0x6a6   : > { %2626 = vmatprep.subr.mxu1 %v2950_v63 }
 0x6a7   : > { %2627 = vmatpush3.msra.mxu1 %v2170_v15 }
 0x6a8   : > { %2628 = vmatprep.subr.mxu1 %v2950_v63 }
 0x6a9   : > { %2629 = vmatpush3.msra.mxu1 %v2169_v16 }
 0x6aa   : > { %2630 = vmatprep.subr.mxu1 %v2950_v63 }
 0x6ab   : > { %2631 = vmatpush3.msra.mxu1 %v2168_v17 }
 0x6ac   : > { %2632 = vmatprep.subr.mxu1 %v2950_v63 }
 0x6ad   : > { %2633 = vmatpush3.msra.mxu1 %v2167_v18 }
 0x6ae   : > { %2634 = vmatprep.subr.mxu1 %v2950_v63 }
 0x6af   : > { %2635 = vmatpush3.msra.mxu1 %v2166_v19 }
 0x6b0   : > { %2636 = vmatprep.subr.mxu1 %v2950_v63 }
 0x6b1   : > { %2637 = vmatpush3.msra.mxu1 %v2165_v20 }
 0x6b2   : > { %2638 = vmatprep.subr.mxu1 %v2950_v63 }
 0x6b3   : > { %2639 = vmatpush3.msra.mxu1 %v2164_v21 }
 0x6b4   : > { %2640 = vmatprep.subr.mxu1 %v2950_v63 }
 0x6b5   : > { %2641 = vmatpush3.msra.mxu1 %v2163_v22 }
 0x6b6   : > { %2642 = vmatprep.subr.mxu1 %v2950_v63 }
 0x6b7   : > { %2643 = vmatpush3.msra.mxu1 %v2162_v23 }
 0x6b8   : > { %2644 = vmatprep.subr.mxu1 %v2950_v63 }
 0x6b9   : > { %2645 = vmatpush3.msra.mxu1 %v2161_v24 }
 0x6ba   : > { %2646 = vmatprep.subr.mxu1 %v2950_v63 }
 0x6bb   : > { %2647 = vmatpush3.msra.mxu1 %v2160_v34 }
 0x6bc   : > { %2648 = vmatprep.subr.mxu1 %v2950_v63 }
 0x6bd   : > { %2649 = vmatpush3.msra.mxu1 %v2159_v35 }
 0x6be   : > { %2650 = vmatprep.subr.mxu1 %v2950_v63 }
 0x6bf   : > { %2651 = vmatpush3.msra.mxu1 %v2158_v36 }
 0x760   : > { %v2031_v50 = vpop.f32.mrf.mxu1 }
 0x761   : > { %v2032_v51 = vadd.f32 %v2394_v49, %v2031_v50 }
 0x762   : > { %v2584_v52 = vpop.f32.mrf.mxu1 }
 0x763   : > { %v3410_v53 = vadd.f32 %v2032_v51, %v3171_v0  ;;  %v2074_v0 = vld [vmem:[#allocation7 + $0x50] sm:$0xff] }
 0x764   : > { %2596 = vmatpush3.msra.mxu0 %v2074_v0 }
 0x765   : > { %2038 = vadd.xlane.f32.xlu1 %v3410_v53  ;;  %2597 = vmatprep.subr.mxu0 %v2950_v63 }
 0x766   : > { %2598 = vmatpush3.msra.mxu0 %v2073_v59 }
 0x767   : > { %2599 = vmatprep.subr.mxu0 %v2950_v63 }
 0x768   : > { %2600 = vmatpush3.msra.mxu0 %v2072_v5 }
 0x769   : > { %2601 = vmatprep.subr.mxu0 %v2950_v63 }
 0x76a   : > { %2602 = vmatpush3.msra.mxu0 %v2071_v6 }
 0x76b   : > { %2603 = vmatprep.subr.mxu0 %v2950_v63 }
 0x76c   : > { %2604 = vmatpush3.msra.mxu0 %v2070_v7 }
 0x76d   : > { %2605 = vmatprep.subr.mxu0 %v2950_v63 }
 0x76e   : > { %2606 = vmatpush3.msra.mxu0 %v2069_v1 }
 0x76f   : > { %2607 = vmatprep.subr.mxu0 %v2950_v63 }
 0x770   : > { %2608 = vmatpush3.msra.mxu0 %v2068_v2 }
 0x771   : > { %2609 = vmatprep.subr.mxu0 %v2950_v63 }
 0x772   : > { %2610 = vmatpush3.msra.mxu0 %v2067_v8 }
 0x773   : > { %2611 = vmatprep.subr.mxu0 %v2950_v63 }
 0x774   : > { %2612 = vmatpush3.msra.mxu0 %v2066_v9 }
 0x775   : > { %2613 = vmatprep.subr.mxu0 %v2950_v63 }
 0x776   : > { %2614 = vmatpush3.msra.mxu0 %v2065_v10 }
 0x777   : > { %2615 = vmatprep.subr.mxu0 %v2950_v63 }
 0x778   : > { %2616 = vmatpush3.msra.mxu0 %v2064_v11 }
 0x7ee   : > { %v2039_v60 = vpop.xlane.xlu1 %2038 }
 0x7ef   : > { %v2040_v61 = vmul.f32 0.03125, %v2039_v60 }
 0x7f1   : > { %v2041_v62 = vsub.f32 %v3410_v53, %v2040_v61 }
 0x7f3   : > { %v3423_v3 = vsel %vm503_vm0, %v2041_v62, 0.0 }
 0x7f4   : > { %v2043_v4 = vmul.f32 %v3423_v3, %v3423_v3 }
 0x7f6   : > { %2044 = vadd.xlane.f32.xlu0 %v2043_v4 }
 0x87f   : > { %v2045_v25 = vpop.xlane.xlu0 %2044 }
 0x880   : > { %v2046_v26 = vmul.f32 0.03125, %v2045_v25 }
 0x882   : > { %v2047_v27 = vadd.f32 1e-05, %v2046_v26 }
 0x884   : > { %2761 = vrsqrt.f32 %v2047_v27 }
 0x891   : > { %v2762_v28 = vpop.eup %2761 }
 0x892   : > { %v2049_v30 = vmul.f32 %v2762_v28, %v3423_v3 }
 0x894   : > { %v2056_v32 = vmul.f32 %v2396_v29, %v2049_v30 }
 0x896   : > { %v2063_v33 = vadd.f32 %v2397_v31, %v2056_v32 }
 0x898   : > { %2618 = vmatmul.mubr.f32.vlgmr.msra.gmra.mxu0 %v2063_v33 }
 0x958   : > { %v2153_v38 = vpop.f32.mrf.mxu0 }
 0x959   : > { %v2154_v39 = vadd.f32 %v2398_v37, %v2153_v38 }
 0x95a   : > { %v2619_v40 = vpop.f32.mrf.mxu0 }
 0x95b   : > { %v2157_v41 = vmax.f32 %v2154_v39, 0.0 }
 0x95d   : > { %2653 = vmatmul.mubr.f32.vlgmr.msra.gmra.mxu1 %v2157_v41 }
 0xa1d   : > { %v2247_v43 = vpop.f32.mrf.mxu1 }
 0xa1e   : > { %v2248_v63 = vadd.f32 %v2399_v42, %v2247_v43 }
 0xa1f   : > { %v2654_v44 = vpop.f32.mrf.mxu1 }
 0xa20   : > { %v2251_v45 = vadd.f32 %v2248_v63, %v3410_v53 }
 0xa22   : > { %2252 = vst [vmem:[%s499_s14] sm:$0xff] %v2251_v45 }
 0xa23   : > { %2882 = shalt.err (!%p2879_p9)
}
 0xa24   : > { %s2883_s21 = scalar_lea.hbm %s2265_s15, 128  ;;  %s2887_s27 = scalar_lea.hbm %s3514_s13, 256 }
 0xa25   : > { %p2884_p13 = scmp.ne.s32.totalorder %s2265_s15, %s2883_s21  ;;  %p2888_p11 = scmp.lt.s32.totalorder %s2265_s15, %s3514_s13 }
 0xa26   : > { %p2889_p1 = scmp.lt.s32.totalorder %s2887_s27, %s2883_s21 }
 0xa27   : > { %p2885_p10 = pnand %p2884_p13, %p3548_p6 }
 0xa28   : > { %p2890_p2 = por %p2889_p1, %p2888_p11 }
 0xa29   : > { %p2886_p8 = pneg %p2885_p10 }
 0xa2b   : > { %p2891_p4 = pnand %p2890_p2, %p2886_p8 }
 0xa2d   : > { %2894 = shalt.err (!%p2891_p4)
}
 0xa2e   : > { %2669 = dma.vmem_to_hbm [thread:$0]  (%p3548_p6), %s2268_s16, 128, %s2265_s15, %s2254_s30  }
 0xa2f PF: > { %s3549_s9 = sld [smem:[#allocation15_spill]]  ;;  %p3552_p0 = scmp.ge.s32.totalorder %s2941_s28, 2 }
 0xa30   : > { %s3550_s14 = sld [smem:[#allocation17_spill]] }
 0xa35   : > { %s2279_s20 = sand.u32 1, %s3549_s9  }
 0xa36   : > { %p3551_p12 = scmp.ne.s32.totalorder %s3550_s14, 0  ;;  %s2280_s19 = scalar_lea.sflag [#allocation4], %s2279_s20 }
 0xa38   : > { %p2686_p5 = pnand %p3552_p0, %p3551_p12 }
 0xa3a   : > { %p2687_p3 = pneg %p2686_p5 }
 0xa3c   : > { %2924 = dma.done.wait (%p2687_p3), %s2280_s19, 128  }
 0xa3d   : > { %2926 = vsyncadd (%p2687_p3), %s2280_s19, 4294967168  ;;  %s3553_s28 = sld [smem:[#allocation18_spill]]  ;;  %s3556_s25 = smov %s2933_s26 }
 0xa3e   : > { %s3554_s17 = sld [smem:[#allocation16_spill]] }
 0xa3f   : > { %s3555_s27 = sld [smem:[#allocation19_spill]] }
 0xa43   : > { %p28_p7 = scmp.ge.s32.totalorder %s3553_s28, 4  }
 0xa44   : > { %s3557_s26 = smov %s3554_s17 }
 0xa45   :  { %30 = sbr.rel (!%p28_p7) target bundleno = 11 (0xb), region = 129 }
 0xa4a   :  { %2285 = vsyncpa [#allocation3], 1 }
 0xa4b   :  { %2287 = vsyncpa [#allocation3 + $0x1], 1 }
 0xa4c   :  { %2288 = vsyncpa [#allocation6], 1 }
 0xa4d   :  { %2289 = vsyncpa [#allocation9], 1 }
 0xa4e   :  { %2290 = vsyncpa [#allocation4], 1 }
 0xa4f   :  { %2292 = vsyncpa [#allocation4 + $0x1], 1 }

</bundles_post_ra>
